<compile_context>
chip_gen: v6e
topology: v6e:2x2x1
jax: 0.10.0
libtpu: 0.0.40
codegen_flags: <defaults>
</compile_context>

<pallas_src>
import functools
import math

import jax
import jax.numpy as jnp
from jax.experimental import pallas as pl
from jax.experimental.pallas import tpu as pltpu


# Rows of the packed (6, H) per-feature parameter array.
_BO, _G1, _BE1, _BF2, _G2, _BE2 = range(6)


def _layer_norm(x, gamma, beta, eps=1e-6):
    """slp/annotated-transformer LayerNorm: unbiased (N-1) std, eps added to std."""
    mean = jnp.mean(x, axis=-1, keepdims=True)
    xm = x - mean                                               # computed once
    var = jnp.sum(xm * xm, axis=-1, keepdims=True) * (1.0 / (x.shape[-1] - 1))
    inv = 1.0 / (jnp.sqrt(var) + eps)        # exact divide: keep LN well-conditioned
    return xm * inv * gamma + beta


def encoder_layer_kernel(
    x_ref,        # (1, L, H)  f32   activation slab for this grid step
    wqkv_ref,     # (H, 3H)    bf16  fused [wq * 1/sqrt(dh) | wk | wv]
    wo_ref,       # (H, H)     bf16  attention output projection
    vecs_ref,     # (6, H)     f32   packed [bo, g1, be1, bf2, g2, be2]
    w1_ref,       # (H, inner) bf16
    bf1_ref,      # (1, inner) f32
    w2_ref,       # (inner, H) bf16
    o_ref,        # (1, L, H)  f32
    *, num_heads,
):
    _, L, H = x_ref.shape
    nh = num_heads
    dh = H // nh

    x = x_ref[...].reshape(L, H)                 # lane-dense f32 slab
    xb = x.astype(jnp.bfloat16)

    # ---- fused Q/K/V projection: one lane-dense MXU pass (scale folded into q)
    qkv = jnp.dot(xb, wqkv_ref[...], preferred_element_type=jnp.float32)  # (L, 3H)
    qkv = qkv.astype(jnp.bfloat16)               # one cast covering q, k and v

    # ---- head split (L, 3H) -> 3 x (nh, L, dh): static lane-window copies.
    # This is the unavoidable head relayout; expressed as slices + stack because
    # it lowers robustly at sub-lane head dims.
    # TODO(synk): collapse into a single pltpu.einshape at production dh.
    def split_heads(which):
        base = which * H
        return jnp.stack(
            [qkv[:, base + h * dh:base + (h + 1) * dh] for h in range(nh)],
            axis=0)

    q = split_heads(0)
    k = split_heads(1)
    v = split_heads(2)

    # ---- scaled dot-product attention, batched over heads (scale already in q)
    s = jnp.einsum('hqd,hkd->hqk', q, k,
                   preferred_element_type=jnp.float32)           # (nh, L, L) f32
    s = s - jnp.max(s, axis=-1, keepdims=True)
    # TODO(synk): additive attention_mask would be applied here (f32).
    p = jnp.exp(s)   # TODO(synk): bf16 exp on v6e/v7x doubles EUP throughput
    p = (p * pl.reciprocal(jnp.sum(p, axis=-1, keepdims=True), approx=True)
         ).astype(jnp.bfloat16)
    ao = jnp.einsum('hqk,hkd->hqd', p, v,
                    preferred_element_type=jnp.float32)          # (nh, L, dh)

    # ---- head merge -> lane-dense (L, H); single H-wide output projection
    ctx = jnp.concatenate([ao[h] for h in range(nh)], axis=-1).astype(jnp.bfloat16)
    attn = jnp.dot(ctx, wo_ref[...], preferred_element_type=jnp.float32)
    attn = attn + vecs_ref[_BO:_BO + 1, :]

    # ---- residual + layernorm 1
    out1 = _layer_norm(x + attn,
                       vecs_ref[_G1:_G1 + 1, :], vecs_ref[_BE1:_BE1 + 1, :])

    # ---- position-wise feed forward (bf16 matmuls, f32 accumulate/elementwise)
    hid = jnp.dot(out1.astype(jnp.bfloat16), w1_ref[...],
                  preferred_element_type=jnp.float32) + bf1_ref[...]
    hid = jnp.maximum(hid, 0.0)
    ff = jnp.dot(hid.astype(jnp.bfloat16), w2_ref[...],
                 preferred_element_type=jnp.float32) + vecs_ref[_BF2:_BF2 + 1, :]

    # ---- residual + layernorm 2
    out2 = _layer_norm(out1 + ff,
                       vecs_ref[_G2:_G2 + 1, :], vecs_ref[_BE2:_BE2 + 1, :])
    o_ref[...] = out2.reshape(1, L, H)


def encoder_layer(x, params, num_heads, *, vmem_limit_bytes=32 * 1024 * 1024):
    B, L, H = x.shape
    nh = num_heads
    assert H % nh == 0
    dh = H // nh

    bf16 = jnp.bfloat16
    scale = 1.0 / math.sqrt(dh)

    # Host-side (free) weight prep: fuse q/k/v, fold the softmax scale into q.
    wqkv = jnp.concatenate(
        [params["wq"] * scale, params["wk"], params["wv"]], axis=1).astype(bf16)
    wo = params["wo"].astype(bf16)
    w1 = params["w1"].astype(bf16)
    w2 = params["w2"].astype(bf16)
    # Pack the six H-wide vectors into one array: one DMA'd input instead of six.
    vecs = jnp.concatenate(
        [params["bo"], params["g1"], params["be1"],
         params["bf2"], params["g2"], params["be2"]], axis=0).astype(jnp.float32)
    bf1 = params["bf1"].astype(jnp.float32)

    weights = [wqkv, wo, vecs, w1, bf1, w2]

    in_specs = [pl.BlockSpec((1, L, H), lambda i: (i, 0, 0))]
    for w in weights:
        # Grid-invariant: same full-array block every step.
        # TODO(synk): at production sizes single-buffer these (pl.Buffered(1) /
        #   memory_space=pl.ANY + one manual DMA) to halve weight VMEM residency
        #   (matters on v7x's 64 MiB VMEM).
        in_specs.append(pl.BlockSpec(w.shape, lambda i, n=w.ndim: (0,) * n))

    return pl.pallas_call(
        functools.partial(encoder_layer_kernel, num_heads=nh),
        out_shape=jax.ShapeDtypeStruct((B, L, H), jnp.float32),
        grid_spec=pltpu.PrefetchScalarGridSpec(
            num_scalar_prefetch=0,
            grid=(B,),                      # grid carries the batch (block_b = 1)
            in_specs=in_specs,
            out_specs=pl.BlockSpec((1, L, H), lambda i: (i, 0, 0)),
        ),
        compiler_params=pltpu.CompilerParams(
            dimension_semantics=("parallel",),
            # v7x-safe value; raise on v6e/v5e (128 MiB VMEM) at production shapes.
            vmem_limit_bytes=vmem_limit_bytes,
        ),
    )(x, *weights)


# ----------------------- pure-JAX f32 reference -----------------------
def _ref_layer_norm(x, gamma, beta, eps=1e-6):
    mean = jnp.mean(x, axis=-1, keepdims=True)
    var = jnp.sum((x - mean) ** 2, axis=-1, keepdims=True) / (x.shape[-1] - 1)
    return gamma * (x - mean) / (jnp.sqrt(var) + eps) + beta


def encoder_layer_ref(x, params, num_heads):
    B, L, H = x.shape
    dh = H // num_heads
    q = x @ params["wq"]
    k = x @ params["wk"]
    v = x @ params["wv"]

    def split(t):  # (B, L, H) -> (B, nh, L, dh)
        return t.reshape(B, L, num_heads, dh).transpose(0, 2, 1, 3)

    qh, kh, vh = split(q), split(k), split(v)
    s = jnp.einsum("bhqd,bhkd->bhqk", qh, kh) / math.sqrt(dh)
    p = jax.nn.softmax(s, axis=-1)
    attn = jnp.einsum("bhqk,bhkd->bhqd", p, vh).transpose(0, 2, 1, 3).reshape(B, L, H)
    attn = attn @ params["wo"] + params["bo"]
    out1 = _ref_layer_norm(x + attn, params["g1"], params["be1"])
    ff = jnp.maximum(out1 @ params["w1"] + params["bf1"], 0.0) @ params["w2"] + params["bf2"]
    return _ref_layer_norm(out1 + ff, params["g2"], params["be2"])


# ----------------------- main -----------------------
if __name__ == "__main__":
    B, L, H = 2, 16, 128          # H = 128 keeps the output store lane-dense
    NUM_HEADS = 4                 # dh = 32
    INNER = 256

    key = jax.random.PRNGKey(0)
    keys = jax.random.split(key, 8)

    def xavier(k, shape):
        fan_in, fan_out = shape[0], shape[-1]
        lim = math.sqrt(6.0 / (fan_in + fan_out))
        return jax.random.uniform(k, shape, jnp.float32, -lim, lim)

    params = {
        # attention (stored as (in, out) so forward is x @ W)
        "wq": xavier(keys[0], (H, H)),
        "wk": xavier(keys[1], (H, H)),
        "wv": xavier(keys[2], (H, H)),
        "wo": xavier(keys[3], (H, H)),
        "bo": jnp.zeros((1, H), jnp.float32),
        # layernorm 1
        "g1": jnp.ones((1, H), jnp.float32),
        "be1": jnp.zeros((1, H), jnp.float32),
        # feed-forward
        "w1": xavier(keys[4], (H, INNER)),
        "bf1": jnp.full((1, INNER), 0.01, jnp.float32),
        "w2": xavier(keys[5], (INNER, H)),
        "bf2": jnp.full((1, H), 0.01, jnp.float32),
        # layernorm 2
        "g2": jnp.ones((1, H), jnp.float32),
        "be2": jnp.zeros((1, H), jnp.float32),
    }

    x = jax.random.normal(keys[6], (B, L, H), jnp.float32)

    out = encoder_layer(x, params, NUM_HEADS)
    out = jax.block_until_ready(out)

    ref = encoder_layer_ref(x, params, NUM_HEADS)
    assert out.shape == (B, L, H)
    # Kernel matmuls run in bf16 (f32 MXU accumulation) and the softmax uses the
    # approx EUP reciprocal, so tolerance vs the pure-f32 reference is relaxed;
    # structural bugs (e.g. head-merge ordering) would produce O(1) errors and
    # are still caught at this tolerance.  LayerNorm uses exact division.
    assert jnp.allclose(out, ref, atol=5e-2, rtol=5e-2), (
        f"max abs diff {jnp.max(jnp.abs(out - ref))}"
    )
    print("KERNEL_OK")
</pallas_src>

<mosaic_0001>
module attributes {stable_mosaic.version = 11 : i64} {
  func.func @encoder_layer_kernel(%arg0: i32, %arg1: memref<1x16x128xf32, #tpu.memory_space<vmem>>, %arg2: memref<128x384xbf16, #tpu.memory_space<vmem>>, %arg3: memref<128x128xbf16, #tpu.memory_space<vmem>>, %arg4: memref<6x128xf32, #tpu.memory_space<vmem>>, %arg5: memref<128x256xbf16, #tpu.memory_space<vmem>>, %arg6: memref<1x256xf32, #tpu.memory_space<vmem>>, %arg7: memref<256x128xbf16, #tpu.memory_space<vmem>>, %arg8: memref<1x16x128xf32, #tpu.memory_space<vmem>>) attributes {dimension_semantics = [#tpu.dimension_semantics<parallel>], iteration_bounds = array<i64: 2>, scalar_prefetch = 0 : i64, scratch_operands = 0 : i64, tpu.core_type = #tpu.core_type<tc>, window_params = [{transform_indices = @transform_0, window_bounds = array<i64: 1, 16, 128>}, {pipeline_mode = #tpu.pipeline_mode<synchronous>, transform_indices = @transform_1, window_bounds = array<i64: 128, 384>}, {pipeline_mode = #tpu.pipeline_mode<synchronous>, transform_indices = @transform_2, window_bounds = array<i64: 128, 128>}, {pipeline_mode = #tpu.pipeline_mode<synchronous>, transform_indices = @transform_3, window_bounds = array<i64: 6, 128>}, {pipeline_mode = #tpu.pipeline_mode<synchronous>, transform_indices = @transform_4, window_bounds = array<i64: 128, 256>}, {pipeline_mode = #tpu.pipeline_mode<synchronous>, transform_indices = @transform_5, window_bounds = array<i64: 1, 256>}, {pipeline_mode = #tpu.pipeline_mode<synchronous>, transform_indices = @transform_6, window_bounds = array<i64: 256, 128>}, {transform_indices = @transform_7, window_bounds = array<i64: 1, 16, 128>}]} {
    %c0 = arith.constant 0 : index
    %c0_0 = arith.constant 0 : index
    %c0_1 = arith.constant 0 : index
    %0 = vector.load %arg1[%c0, %c0_0, %c0_1] : memref<1x16x128xf32, #tpu.memory_space<vmem>>, vector<1x16x128xf32>
    %1 = vector.shape_cast %0 : vector<1x16x128xf32> to vector<16x128xf32>
    %2 = arith.truncf %1 : vector<16x128xf32> to vector<16x128xbf16>
    %c0_2 = arith.constant 0 : index
    %c0_3 = arith.constant 0 : index
    %3 = vector.load %arg2[%c0_2, %c0_3] : memref<128x384xbf16, #tpu.memory_space<vmem>>, vector<128x384xbf16>
    %cst = arith.constant dense<0.000000e+00> : vector<16x384xf32>
    %4 = tpu.matmul %2, %3, %cst {dimension_numbers = #tpu.dot_dimension_numbers<[1], [0], [0], [1], [0, 0, 1, 1], [], []>} : vector<16x128xbf16>, vector<128x384xbf16>, vector<16x384xf32> -> vector<16x384xf32>
    %5 = arith.truncf %4 : vector<16x384xf32> to vector<16x384xbf16>
    %6 = vector.extract_strided_slice %5 {offsets = [0, 0], sizes = [16, 32], strides = [1, 1]} : vector<16x384xbf16> to vector<16x32xbf16>
    %7 = vector.extract_strided_slice %5 {offsets = [0, 32], sizes = [16, 32], strides = [1, 1]} : vector<16x384xbf16> to vector<16x32xbf16>
    %8 = vector.extract_strided_slice %5 {offsets = [0, 64], sizes = [16, 32], strides = [1, 1]} : vector<16x384xbf16> to vector<16x32xbf16>
    %9 = vector.extract_strided_slice %5 {offsets = [0, 96], sizes = [16, 32], strides = [1, 1]} : vector<16x384xbf16> to vector<16x32xbf16>
    %10 = vector.shape_cast %6 : vector<16x32xbf16> to vector<1x16x32xbf16>
    %11 = vector.shape_cast %7 : vector<16x32xbf16> to vector<1x16x32xbf16>
    %12 = vector.shape_cast %8 : vector<16x32xbf16> to vector<1x16x32xbf16>
    %13 = vector.shape_cast %9 : vector<16x32xbf16> to vector<1x16x32xbf16>
    %14 = tpu.concatenate %10, %11, %12, %13 in 0 : vector<1x16x32xbf16>, vector<1x16x32xbf16>, vector<1x16x32xbf16>, vector<1x16x32xbf16> -> vector<4x16x32xbf16>
    %15 = vector.extract_strided_slice %5 {offsets = [0, 128], sizes = [16, 32], strides = [1, 1]} : vector<16x384xbf16> to vector<16x32xbf16>
    %16 = vector.extract_strided_slice %5 {offsets = [0, 160], sizes = [16, 32], strides = [1, 1]} : vector<16x384xbf16> to vector<16x32xbf16>
    %17 = vector.extract_strided_slice %5 {offsets = [0, 192], sizes = [16, 32], strides = [1, 1]} : vector<16x384xbf16> to vector<16x32xbf16>
    %18 = vector.extract_strided_slice %5 {offsets = [0, 224], sizes = [16, 32], strides = [1, 1]} : vector<16x384xbf16> to vector<16x32xbf16>
    %19 = vector.shape_cast %15 : vector<16x32xbf16> to vector<1x16x32xbf16>
    %20 = vector.shape_cast %16 : vector<16x32xbf16> to vector<1x16x32xbf16>
    %21 = vector.shape_cast %17 : vector<16x32xbf16> to vector<1x16x32xbf16>
    %22 = vector.shape_cast %18 : vector<16x32xbf16> to vector<1x16x32xbf16>
    %23 = tpu.concatenate %19, %20, %21, %22 in 0 : vector<1x16x32xbf16>, vector<1x16x32xbf16>, vector<1x16x32xbf16>, vector<1x16x32xbf16> -> vector<4x16x32xbf16>
    %24 = vector.extract_strided_slice %5 {offsets = [0, 256], sizes = [16, 32], strides = [1, 1]} : vector<16x384xbf16> to vector<16x32xbf16>
    %25 = vector.extract_strided_slice %5 {offsets = [0, 288], sizes = [16, 32], strides = [1, 1]} : vector<16x384xbf16> to vector<16x32xbf16>
    %26 = vector.extract_strided_slice %5 {offsets = [0, 320], sizes = [16, 32], strides = [1, 1]} : vector<16x384xbf16> to vector<16x32xbf16>
    %27 = vector.extract_strided_slice %5 {offsets = [0, 352], sizes = [16, 32], strides = [1, 1]} : vector<16x384xbf16> to vector<16x32xbf16>
    %28 = vector.shape_cast %24 : vector<16x32xbf16> to vector<1x16x32xbf16>
    %29 = vector.shape_cast %25 : vector<16x32xbf16> to vector<1x16x32xbf16>
    %30 = vector.shape_cast %26 : vector<16x32xbf16> to vector<1x16x32xbf16>
    %31 = vector.shape_cast %27 : vector<16x32xbf16> to vector<1x16x32xbf16>
    %32 = tpu.concatenate %28, %29, %30, %31 in 0 : vector<1x16x32xbf16>, vector<1x16x32xbf16>, vector<1x16x32xbf16>, vector<1x16x32xbf16> -> vector<4x16x32xbf16>
    "tpu.trace_start"() <{level = 10 : i32, message = "hqd,hkd->hqk"}> : () -> ()
    %cst_4 = arith.constant dense<0.000000e+00> : vector<4x16x16xf32>
    %33 = tpu.matmul %14, %23, %cst_4 {dimension_numbers = #tpu.dot_dimension_numbers<[2], [2], [1], [1], [0, 0, 0, 1, 1, 1], [0], [0]>} : vector<4x16x32xbf16>, vector<4x16x32xbf16>, vector<4x16x16xf32> -> vector<4x16x16xf32>
    "tpu.trace_stop"() : () -> ()
    %cst_5 = arith.constant dense<0xFF800000> : vector<4x16xf32>
    %34 = vector.multi_reduction <maximumf>, %33, %cst_5 [2] : vector<4x16x16xf32> to vector<4x16xf32>
    %35 = vector.shape_cast %34 : vector<4x16xf32> to vector<4x16x1xf32>
    %36 = vector.broadcast %35 : vector<4x16x1xf32> to vector<4x16x16xf32>
    %37 = arith.subf %33, %36 : vector<4x16x16xf32>
    %38 = math.exp %37 : vector<4x16x16xf32>
    %cst_6 = arith.constant dense<0.000000e+00> : vector<4x16xf32>
    %39 = vector.multi_reduction <add>, %38, %cst_6 [2] : vector<4x16x16xf32> to vector<4x16xf32>
    %40 = vector.shape_cast %39 : vector<4x16xf32> to vector<4x16x1xf32>
    %41 = tpu.reciprocal %40 {approx = true} : vector<4x16x1xf32> -> vector<4x16x1xf32>
    %42 = vector.broadcast %41 : vector<4x16x1xf32> to vector<4x16x16xf32>
    %43 = arith.mulf %38, %42 : vector<4x16x16xf32>
    %44 = arith.truncf %43 : vector<4x16x16xf32> to vector<4x16x16xbf16>
    "tpu.trace_start"() <{level = 10 : i32, message = "hqk,hkd->hqd"}> : () -> ()
    %cst_7 = arith.constant dense<0.000000e+00> : vector<4x16x32xf32>
    %45 = tpu.matmul %44, %32, %cst_7 {dimension_numbers = #tpu.dot_dimension_numbers<[2], [1], [1], [2], [0, 0, 0, 1, 1, 2], [0], [0]>} : vector<4x16x16xbf16>, vector<4x16x32xbf16>, vector<4x16x32xf32> -> vector<4x16x32xf32>
    "tpu.trace_stop"() : () -> ()
    %46 = vector.extract_strided_slice %45 {offsets = [0, 0, 0], sizes = [1, 16, 32], strides = [1, 1, 1]} : vector<4x16x32xf32> to vector<1x16x32xf32>
    %47 = vector.shape_cast %46 : vector<1x16x32xf32> to vector<16x32xf32>
    %48 = vector.extract_strided_slice %45 {offsets = [1, 0, 0], sizes = [1, 16, 32], strides = [1, 1, 1]} : vector<4x16x32xf32> to vector<1x16x32xf32>
    %49 = vector.shape_cast %48 : vector<1x16x32xf32> to vector<16x32xf32>
    %50 = vector.extract_strided_slice %45 {offsets = [2, 0, 0], sizes = [1, 16, 32], strides = [1, 1, 1]} : vector<4x16x32xf32> to vector<1x16x32xf32>
    %51 = vector.shape_cast %50 : vector<1x16x32xf32> to vector<16x32xf32>
    %52 = vector.extract_strided_slice %45 {offsets = [3, 0, 0], sizes = [1, 16, 32], strides = [1, 1, 1]} : vector<4x16x32xf32> to vector<1x16x32xf32>
    %53 = vector.shape_cast %52 : vector<1x16x32xf32> to vector<16x32xf32>
    %54 = tpu.concatenate %47, %49, %51, %53 in 1 : vector<16x32xf32>, vector<16x32xf32>, vector<16x32xf32>, vector<16x32xf32> -> vector<16x128xf32>
    %55 = arith.truncf %54 : vector<16x128xf32> to vector<16x128xbf16>
    %c0_8 = arith.constant 0 : index
    %c0_9 = arith.constant 0 : index
    %56 = vector.load %arg3[%c0_8, %c0_9] : memref<128x128xbf16, #tpu.memory_space<vmem>>, vector<128x128xbf16>
    %cst_10 = arith.constant dense<0.000000e+00> : vector<16x128xf32>
    %57 = tpu.matmul %55, %56, %cst_10 {dimension_numbers = #tpu.dot_dimension_numbers<[1], [0], [0], [1], [0, 0, 1, 1], [], []>} : vector<16x128xbf16>, vector<128x128xbf16>, vector<16x128xf32> -> vector<16x128xf32>
    %c0_11 = arith.constant 0 : index
    %c0_12 = arith.constant 0 : index
    %58 = vector.load %arg4[%c0_11, %c0_12] : memref<6x128xf32, #tpu.memory_space<vmem>>, vector<1x128xf32>
    %59 = vector.broadcast %58 : vector<1x128xf32> to vector<16x128xf32>
    %60 = arith.addf %57, %59 : vector<16x128xf32>
    %61 = arith.addf %1, %60 : vector<16x128xf32>
    %c1 = arith.constant 1 : index
    %c0_13 = arith.constant 0 : index
    %62 = vector.load %arg4[%c1, %c0_13] : memref<6x128xf32, #tpu.memory_space<vmem>>, vector<1x128xf32>
    %c2 = arith.constant 2 : index
    %c0_14 = arith.constant 0 : index
    %63 = vector.load %arg4[%c2, %c0_14] : memref<6x128xf32, #tpu.memory_space<vmem>>, vector<1x128xf32>
    %cst_15 = arith.constant dense<0.000000e+00> : vector<16xf32>
    %64 = vector.multi_reduction <add>, %61, %cst_15 [1] : vector<16x128xf32> to vector<16xf32>
    %65 = vector.shape_cast %64 : vector<16xf32> to vector<16x1xf32>
    %cst_16 = arith.constant 1.280000e+02 : f32
    %66 = vector.broadcast %cst_16 : f32 to vector<16x1xf32>
    %67 = arith.divf %65, %66 : vector<16x1xf32>
    %68 = vector.broadcast %67 : vector<16x1xf32> to vector<16x128xf32>
    %69 = arith.subf %61, %68 : vector<16x128xf32>
    %70 = arith.mulf %69, %69 : vector<16x128xf32>
    %cst_17 = arith.constant dense<0.000000e+00> : vector<16xf32>
    %71 = vector.multi_reduction <add>, %70, %cst_17 [1] : vector<16x128xf32> to vector<16xf32>
    %72 = vector.shape_cast %71 : vector<16xf32> to vector<16x1xf32>
    %cst_18 = arith.constant 0.00787401571 : f32
    %73 = vector.broadcast %cst_18 : f32 to vector<16x1xf32>
    %74 = arith.mulf %72, %73 : vector<16x1xf32>
    %75 = math.sqrt %74 : vector<16x1xf32>
    %cst_19 = arith.constant 9.99999997E-7 : f32
    %76 = vector.broadcast %cst_19 : f32 to vector<16x1xf32>
    %77 = arith.addf %75, %76 : vector<16x1xf32>
    %cst_20 = arith.constant 1.000000e+00 : f32
    %78 = vector.broadcast %cst_20 : f32 to vector<16x1xf32>
    %79 = arith.divf %78, %77 : vector<16x1xf32>
    %80 = vector.broadcast %79 : vector<16x1xf32> to vector<16x128xf32>
    %81 = arith.mulf %69, %80 : vector<16x128xf32>
    %82 = vector.broadcast %62 : vector<1x128xf32> to vector<16x128xf32>
    %83 = arith.mulf %81, %82 : vector<16x128xf32>
    %84 = vector.broadcast %63 : vector<1x128xf32> to vector<16x128xf32>
    %85 = arith.addf %83, %84 : vector<16x128xf32>
    %86 = arith.truncf %85 : vector<16x128xf32> to vector<16x128xbf16>
    %c0_21 = arith.constant 0 : index
    %c0_22 = arith.constant 0 : index
    %87 = vector.load %arg5[%c0_21, %c0_22] : memref<128x256xbf16, #tpu.memory_space<vmem>>, vector<128x256xbf16>
    %cst_23 = arith.constant dense<0.000000e+00> : vector<16x256xf32>
    %88 = tpu.matmul %86, %87, %cst_23 {dimension_numbers = #tpu.dot_dimension_numbers<[1], [0], [0], [1], [0, 0, 1, 1], [], []>} : vector<16x128xbf16>, vector<128x256xbf16>, vector<16x256xf32> -> vector<16x256xf32>
    %c0_24 = arith.constant 0 : index
    %c0_25 = arith.constant 0 : index
    %89 = vector.load %arg6[%c0_24, %c0_25] : memref<1x256xf32, #tpu.memory_space<vmem>>, vector<1x256xf32>
    %90 = vector.broadcast %89 : vector<1x256xf32> to vector<16x256xf32>
    %91 = arith.addf %88, %90 : vector<16x256xf32>
    %cst_26 = arith.constant 0.000000e+00 : f32
    %92 = vector.broadcast %cst_26 : f32 to vector<16x256xf32>
    %93 = arith.maximumf %91, %92 : vector<16x256xf32>
    %94 = arith.truncf %93 : vector<16x256xf32> to vector<16x256xbf16>
    %c0_27 = arith.constant 0 : index
    %c0_28 = arith.constant 0 : index
    %95 = vector.load %arg7[%c0_27, %c0_28] : memref<256x128xbf16, #tpu.memory_space<vmem>>, vector<256x128xbf16>
    %cst_29 = arith.constant dense<0.000000e+00> : vector<16x128xf32>
    %96 = tpu.matmul %94, %95, %cst_29 {dimension_numbers = #tpu.dot_dimension_numbers<[1], [0], [0], [1], [0, 0, 1, 1], [], []>} : vector<16x256xbf16>, vector<256x128xbf16>, vector<16x128xf32> -> vector<16x128xf32>
    %c3 = arith.constant 3 : index
    %c0_30 = arith.constant 0 : index
    %97 = vector.load %arg4[%c3, %c0_30] : memref<6x128xf32, #tpu.memory_space<vmem>>, vector<1x128xf32>
    %98 = vector.broadcast %97 : vector<1x128xf32> to vector<16x128xf32>
    %99 = arith.addf %96, %98 : vector<16x128xf32>
    %100 = arith.addf %85, %99 : vector<16x128xf32>
    %c4 = arith.constant 4 : index
    %c0_31 = arith.constant 0 : index
    %101 = vector.load %arg4[%c4, %c0_31] : memref<6x128xf32, #tpu.memory_space<vmem>>, vector<1x128xf32>
    %c5 = arith.constant 5 : index
    %c0_32 = arith.constant 0 : index
    %102 = vector.load %arg4[%c5, %c0_32] : memref<6x128xf32, #tpu.memory_space<vmem>>, vector<1x128xf32>
    %cst_33 = arith.constant dense<0.000000e+00> : vector<16xf32>
    %103 = vector.multi_reduction <add>, %100, %cst_33 [1] : vector<16x128xf32> to vector<16xf32>
    %104 = vector.shape_cast %103 : vector<16xf32> to vector<16x1xf32>
    %cst_34 = arith.constant 1.280000e+02 : f32
    %105 = vector.broadcast %cst_34 : f32 to vector<16x1xf32>
    %106 = arith.divf %104, %105 : vector<16x1xf32>
    %107 = vector.broadcast %106 : vector<16x1xf32> to vector<16x128xf32>
    %108 = arith.subf %100, %107 : vector<16x128xf32>
    %109 = arith.mulf %108, %108 : vector<16x128xf32>
    %cst_35 = arith.constant dense<0.000000e+00> : vector<16xf32>
    %110 = vector.multi_reduction <add>, %109, %cst_35 [1] : vector<16x128xf32> to vector<16xf32>
    %111 = vector.shape_cast %110 : vector<16xf32> to vector<16x1xf32>
    %cst_36 = arith.constant 0.00787401571 : f32
    %112 = vector.broadcast %cst_36 : f32 to vector<16x1xf32>
    %113 = arith.mulf %111, %112 : vector<16x1xf32>
    %114 = math.sqrt %113 : vector<16x1xf32>
    %cst_37 = arith.constant 9.99999997E-7 : f32
    %115 = vector.broadcast %cst_37 : f32 to vector<16x1xf32>
    %116 = arith.addf %114, %115 : vector<16x1xf32>
    %cst_38 = arith.constant 1.000000e+00 : f32
    %117 = vector.broadcast %cst_38 : f32 to vector<16x1xf32>
    %118 = arith.divf %117, %116 : vector<16x1xf32>
    %119 = vector.broadcast %118 : vector<16x1xf32> to vector<16x128xf32>
    %120 = arith.mulf %108, %119 : vector<16x128xf32>
    %121 = vector.broadcast %101 : vector<1x128xf32> to vector<16x128xf32>
    %122 = arith.mulf %120, %121 : vector<16x128xf32>
    %123 = vector.broadcast %102 : vector<1x128xf32> to vector<16x128xf32>
    %124 = arith.addf %122, %123 : vector<16x128xf32>
    %125 = vector.shape_cast %124 : vector<16x128xf32> to vector<1x16x128xf32>
    %c0_39 = arith.constant 0 : index
    %c0_40 = arith.constant 0 : index
    %c0_41 = arith.constant 0 : index
    %126 = vector.load %arg8[%c0_39, %c0_40, %c0_41] : memref<1x16x128xf32, #tpu.memory_space<vmem>>, vector<1x16x128xf32>
    tpu.vector_store %arg8[%c0_39, %c0_40, %c0_41], %125 {strides = array<i32>} : memref<1x16x128xf32, #tpu.memory_space<vmem>>, vector<1x16x128xf32>,
    return
  }
  func.func @transform_0(%arg0: i32) -> (i32, i32, i32) {
    %c0_i32 = arith.constant 0 : i32
    %c0_i32_0 = arith.constant 0 : i32
    %c0_i32_1 = arith.constant 0 : i32
    return %arg0, %c0_i32, %c0_i32_0 : i32, i32, i32
  }
  func.func @transform_1(%arg0: i32) -> (i32, i32) {
    %c0_i32 = arith.constant 0 : i32
    %c0_i32_0 = arith.constant 0 : i32
    %c0_i32_1 = arith.constant 0 : i32
    return %c0_i32, %c0_i32_0 : i32, i32
  }
  func.func @transform_2(%arg0: i32) -> (i32, i32) {
    %c0_i32 = arith.constant 0 : i32
    %c0_i32_0 = arith.constant 0 : i32
    %c0_i32_1 = arith.constant 0 : i32
    return %c0_i32, %c0_i32_0 : i32, i32
  }
  func.func @transform_3(%arg0: i32) -> (i32, i32) {
    %c0_i32 = arith.constant 0 : i32
    %c0_i32_0 = arith.constant 0 : i32
    %c0_i32_1 = arith.constant 0 : i32
    return %c0_i32, %c0_i32_0 : i32, i32
  }
  func.func @transform_4(%arg0: i32) -> (i32, i32) {
    %c0_i32 = arith.constant 0 : i32
    %c0_i32_0 = arith.constant 0 : i32
    %c0_i32_1 = arith.constant 0 : i32
    return %c0_i32, %c0_i32_0 : i32, i32
  }
  func.func @transform_5(%arg0: i32) -> (i32, i32) {
    %c0_i32 = arith.constant 0 : i32
    %c0_i32_0 = arith.constant 0 : i32
    %c0_i32_1 = arith.constant 0 : i32
    return %c0_i32, %c0_i32_0 : i32, i32
  }
  func.func @transform_6(%arg0: i32) -> (i32, i32) {
    %c0_i32 = arith.constant 0 : i32
    %c0_i32_0 = arith.constant 0 : i32
    %c0_i32_1 = arith.constant 0 : i32
    return %c0_i32, %c0_i32_0 : i32, i32
  }
  func.func @transform_7(%arg0: i32) -> (i32, i32, i32) {
    %c0_i32 = arith.constant 0 : i32
    %c0_i32_0 = arith.constant 0 : i32
    %c0_i32_1 = arith.constant 0 : i32
    return %arg0, %c0_i32, %c0_i32_0 : i32, i32, i32
  }
}

</mosaic_0001>

<bundles_post_ra>
// kernel: tpu_custom_call.1
= control target key start
LH: loop header
LB: loop body
LE: loop exit
PB: predicated region body
PF: predicated region fallthrough
CT: control target
= control target key end

     0   :  { %s2980_s0 = inlined_call_operand.hbm [shape: f32[2,16,128], index: 0, kind: input, shape index: {}]   ;;  %s2981_s1 = inlined_call_operand.hbm [shape: bf16[128,384], index: 1, kind: input, shape index: {}]   ;;  %s2982_s2 = inlined_call_operand.hbm [shape: bf16[128,128], index: 2, kind: input, shape index: {}]   ;;  %s2983_s3 = inlined_call_operand.hbm [shape: f32[6,128], index: 3, kind: input, shape index: {}]   ;;  %s2984_s4 = inlined_call_operand.hbm [shape: bf16[128,256], index: 4, kind: input, shape index: {}]   ;;  %s2985_s5 = inlined_call_operand.vmem [shape: f32[1,256], index: 5, kind: input, shape index: {}]   ;;  %s2986_s6 = inlined_call_operand.hbm [shape: bf16[256,128], index: 6, kind: input, shape index: {}]   ;;  %s2987_s7 = inlined_call_operand.hbm [shape: f32[2,16,128], index: 7, kind: output, shape index: {}]  }
   0x1   :  { %2994 = sst [smem:[#allocation19_spill]] %s2981_s1 }
   0x2   :  { %12 = vsyncpa [#allocation3], 0 }
   0x3   :  { %14 = vsyncpa [#allocation3 + $0x1], 0 }
   0x4   :  { %15 = vsyncpa [#allocation6], 0 }
   0x5   :  { %16 = vsyncpa [#allocation9], 0 }
   0x6   :  { %17 = vsyncpa [#allocation12], 0 }
   0x7   :  { %18 = vsyncpa [#allocation4], 0 }
   0x8   :  { %20 = vsyncpa [#allocation4 + $0x1], 0  ;;  %s2621_s24 = smov 0   ;;  %s2623_s25 = smov 0  }
   0x9   :  { %s2625_s26 = smov 0   ;;  %s2627_s27 = smov 0  }
   0xa LB: > { %s2560_s28 = smov [#allocation5]   ;;  %s2642_s30 = sadd.s32 4294967295, %s2558_s27   ;;  %s2558_s27 = sphi %s2627_s27, %s3020_s27   ;;  %s2554_s26 = sphi %s2625_s26, %s3019_s26   ;;  %s2550_s25 = sphi %s2623_s25, %s3018_s25   ;;  %s2546_s24 = sphi %s2621_s24, %s3017_s24  }
   0xb   : > { %s221_s29 = sshll.u32 %s2560_s28, 4  ;;  %p1823_p0 = scmp.ge.s32.totalorder %s2558_s27, 1  ;;  %s222_s29 = int_to_ptr.vmem [resolvable:$true] %s221_s29 }
   0xc   : > { %p2988_p1 = scmp.eq.s32.totalorder %s2642_s30, 0  ;;  %p209_p2 = scmp.lt.s32.totalorder %s2558_s27, 3 }
   0xd   : > { %s2561_s9 = smov [#allocation8]   ;;  %s2562_s12 = smov [#allocation7]  }
   0xe   : > { %p2647_p3 = pnand %p1823_p0, %p209_p2  ;;  %s248_s10 = sshll.u32 %s2561_s9, 4  ;;  %s249_s10 = int_to_ptr.vmem [resolvable:$true] %s248_s10 }
   0xf   : > { %s234_s13 = sshll.u32 %s2562_s12, 4  ;;  %s2335_s15 = scalar_lea.vmem %s222_s29, 3072  ;;  %s2660_s13 = int_to_ptr.vmem [resolvable:$true] %s234_s13 }
  0x10   : > { %s2995_s8 = scalar_select %p2647_p3, 1, 0 }
  0x11   : > { %p2094_p5 = pneg %p2647_p3  ;;  %p2336_p8 = scmp.ne.s32.totalorder %s222_s29, %s2335_s15 }
  0x12   : > { %p2343_p11 = scmp.lt.s32.totalorder %s222_s29, %s222_s29  ;;  %p2344_p12 = scmp.lt.s32.totalorder %s2335_s15, %s2335_s15 }
  0x13   : > { %p2656_p6 = pnand %p2094_p5, %p2988_p1 }
  0x14   : > { %p2345_p13 = por %p2344_p12, %p2343_p11 }
  0x15   : > { %p2664_p7 = pneg %p2656_p6 }
  0x17   : > { %p2338_p9 = pnand %p2336_p8, %p2664_p7 }
  0x19   : > { %p2339_p10 = pneg %p2338_p9 }
  0x1b   : > { %p2346_p0 = pnand %p2345_p13, %p2339_p10 }
  0x1d   : > { %2349 = shalt.err (!%p2346_p0)
}
  0x1e   : > { %s2563_s16 = smov 192   ;;  %s2564_s17 = smov 12  }
  0x1f   : > { %s2998_s1 = sld [smem:[#allocation19_spill]]  ;;  %s2361_s20 = scalar_lea.vmem %s249_s10, 128 }
  0x20   : > { %p2362_p2 = scmp.ne.s32.totalorder %s249_s10, %s2361_s20  ;;  %p2369_p9 = scmp.lt.s32.totalorder %s249_s10, %s249_s10 }
  0x21   : > { %p2370_p4 = scmp.lt.s32.totalorder %s2361_s20, %s2361_s20 }
  0x22   : > { %p2364_p5 = pnand %p2362_p2, %p2664_p7 }
  0x23   : > { %p2371_p1 = por %p2370_p4, %p2369_p9 }
  0x24   : > { %p2365_p8 = pneg %p2364_p5 }
  0x25   : > { %2097 = dma.hbm_to_vmem [thread:$0]  (!%p2656_p6), %s2998_s1, 3072, %s222_s29, [#allocation6], %s2563_s16, %s2563_s16, %s2564_s17  }
  0x26   : > { %p2372_p11 = pnand %p2371_p1, %p2365_p8 }
  0x28   : > { %2375 = shalt.err (!%p2372_p11)
}
  0x29   : > { %2103 = dma.hbm_to_vmem [thread:$0]  (!%p2656_p6), %s2983_s3, 128, %s249_s10, [#allocation9]  }
  0x2a   : > { %s2387_s23 = scalar_lea.vmem %s2660_s13, 1024  ;;  %p2395_p0 = scmp.lt.s32.totalorder %s2660_s13, %s2660_s13 }
  0x2b   : > { %p2388_p10 = scmp.ne.s32.totalorder %s2660_s13, %s2387_s23  ;;  %p2396_p4 = scmp.lt.s32.totalorder %s2387_s23, %s2387_s23 }
  0x2d   : > { %p2390_p12 = pnand %p2388_p10, %p2664_p7  ;;  %p2397_p1 = por %p2396_p4, %p2395_p0 }
  0x2f   : > { %p2391_p13 = pneg %p2390_p12 }
  0x31   : > { %p2398_p2 = pnand %p2397_p1, %p2391_p13 }
  0x33   : > { %2401 = shalt.err (!%p2398_p2)
}
  0x34   : > { %s2565_s28 = smov 64   ;;  %s2566_s29 = smov 4  }
  0x35   : > { %2100 = dma.hbm_to_vmem [thread:$0]  (!%p2656_p6), %s2982_s2, 1024, %s2660_s13, [#allocation6], %s2565_s28, %s2565_s28, %s2566_s29  }
  0x36   : > { %s2567_s12 = smov [#allocation10]  }
  0x37   : > { %s258_s15 = sshll.u32 %s2567_s12, 4  ;;  %s259_s15 = int_to_ptr.vmem [resolvable:$true] %s258_s15 }
  0x38   : > { %s2413_s16 = scalar_lea.vmem %s259_s15, 2048  ;;  %p2421_p11 = scmp.lt.s32.totalorder %s259_s15, %s259_s15 }
  0x39   : > { %p2414_p5 = scmp.ne.s32.totalorder %s259_s15, %s2413_s16  ;;  %p2422_p10 = scmp.lt.s32.totalorder %s2413_s16, %s2413_s16 }
  0x3b   : > { %p2416_p8 = pnand %p2414_p5, %p2664_p7  ;;  %p2423_p12 = por %p2422_p10, %p2421_p11 }
  0x3d   : > { %p2417_p9 = pneg %p2416_p8 }
  0x3f   : > { %p2424_p13 = pnand %p2423_p12, %p2417_p9 }
  0x41   : > { %2427 = shalt.err (!%p2424_p13)
}
  0x42   : > { %s2989_s17 = smov 128   ;;  %s2990_s18 = smov 8  }
  0x43   : > { %2106 = dma.hbm_to_vmem [thread:$0]  (!%p2656_p6), %s2984_s4, 2048, %s259_s15, [#allocation9], %s2989_s17, %s2989_s17, %s2990_s18  }
  0x44   : > { %s2570_s20 = smov [#allocation11]  }
  0x45   : > { %s274_s21 = sshll.u32 %s2570_s20, 4  ;;  %s275_s21 = int_to_ptr.vmem [resolvable:$true] %s274_s21 }
  0x46   : > { %s2439_s22 = scalar_lea.vmem %s275_s21, 2048  ;;  %p2447_p2 = scmp.lt.s32.totalorder %s275_s21, %s275_s21 }
  0x47   : > { %p2440_p0 = scmp.ne.s32.totalorder %s275_s21, %s2439_s22  ;;  %p2448_p5 = scmp.lt.s32.totalorder %s2439_s22, %s2439_s22 }
  0x49   : > { %p2442_p4 = pnand %p2440_p0, %p2664_p7  ;;  %p2449_p8 = por %p2448_p5, %p2447_p2 }
  0x4b   : > { %p2443_p1 = pneg %p2442_p4 }
  0x4d   : > { %p2450_p9 = pnand %p2449_p8, %p2443_p1 }
  0x4f   : > { %2453 = shalt.err (!%p2450_p9)
}
  0x50   : > { %2109 = dma.hbm_to_vmem [thread:$0]  (!%p2656_p6), %s2986_s6, 2048, %s275_s21, [#allocation12], %s2565_s28, %s2565_s28, %s2566_s29  }
  0x51   : > { %s1822_s11 = sadd.s32 4294967294, %s2558_s27   ;;  %s2719_s14 = sadd.s32 1, %s2558_s27  }
  0x52   : > { %s33_s10 = sadd.s32 1, %s2554_s26  ;;  %s30_s12 = ssub.s32 %s2558_s27, %s2719_s14 }
  0x53   : > { %p40_p7 = scmp.ne.s32.totalorder %s2554_s26, %s2550_s25  ;;  %p31_p11 = scmp.eq.s32.totalorder %s30_s12, 0 }
  0x54   : > { %p41_p10 = scmp.eq.s32.totalorder %s2558_s27, 0  ;;  %p46_p12 = scmp.ne.s32.totalorder %s2550_s25, %s2546_s24 }
  0x55   : > { %p196_p13 = scmp.eq.s32.totalorder %s2642_s30, 1  ;;  %p2999_p4 = scmp.eq.s32.totalorder %s2642_s30, 0 }
  0x56   : > { %s2731_s15 = scalar_select %p31_p11, %s2554_s26, %s33_s10  }
  0x57   : > { %p42_p0 = por %p41_p10, %p40_p7  ;;  %p2735_p1 = por %p2999_p4, %p46_p12 }
  0x58   : > { %p2739_p6 = por %p196_p13, %p40_p7  ;;  %p202_p2 = scmp.eq.s32.totalorder %s1822_s11, 1 }
  0x59   : > { %s3000_s16 = scalar_select %p2735_p1, 1, 0 }
  0x5a   : > { %s3001_s28 = scalar_select %p2739_p6, 1, 0 }
  0x5b   : > { %p2123_p5 = scmp.lt.s32.totalorder %s2558_s27, 2  ;;  %s288_s29 = sand.u32 1, %s2554_s26  }
  0x5c   : > { %p2745_p8 = por %p202_p2, %p46_p12  ;;  %s1830_s19 = sshll.u32 %s288_s29, 4 }
  0x5d   : > { %s1924_s20 = sshll.u32 %s2558_s27, 8  ;;  %s292_s9 = scalar_lea.vmem [#allocation2], %s1830_s19 }
  0x5e   : > { %s3002_s13 = scalar_select %p2745_p8, 1, 0 }
  0x5f   : > { %s2753_s23 = scalar_lea.hbm %s2980_s0, %s1924_s20  ;;  %s299_s10 = sshll.u32 %s292_s9, 4  ;;  %s2759_s10 = int_to_ptr.vmem [resolvable:$true] %s299_s10 }
  0x60   : > { %p2755_p9 = pnand %p2123_p5, %p42_p0  ;;  %s2761_s12 = scalar_lea.sflag [#allocation3], %s288_s29 }
  0x61   : > { %s2454_s17 = scalar_lea.hbm %s2753_s23, 256  ;;  %s2459_s19 = scalar_lea.hbm %s2980_s0, 512 }
  0x62   : > { %p2455_p7 = scmp.ne.s32.totalorder %s2753_s23, %s2454_s17  ;;  %p2456_p11 = pneg %p2755_p9 }
  0x63   : > { %p2460_p13 = scmp.lt.s32.totalorder %s2753_s23, %s2980_s0  ;;  %p2461_p0 = scmp.lt.s32.totalorder %s2459_s19, %s2454_s17 }
  0x64   : > { %p2457_p10 = pnand %p2456_p11, %p2455_p7 }
  0x65   : > { %p2462_p4 = por %p2461_p0, %p2460_p13 }
  0x66   : > { %p2458_p12 = pneg %p2457_p10 }
  0x68   : > { %p2463_p2 = pnand %p2462_p4, %p2458_p12 }
  0x6a   : > { %2466 = shalt.err (!%p2463_p2)
}
  0x6b   : > { %s2467_s29 = scalar_lea.vmem %s2759_s10, 256  ;;  %s2571_s18 = smov [#allocation2]  }
  0x6c   : > { %p2468_p5 = scmp.ne.s32.totalorder %s2759_s10, %s2467_s29  ;;  %s2472_s1 = sshll.u32 %s2571_s18, 4  ;;  %s2473_s1 = int_to_ptr.vmem [resolvable:$false] %s2472_s1 }
  0x6d   : > { %s2474_s20 = scalar_lea.vmem %s2473_s1, 512  ;;  %p2475_p10 = scmp.lt.s32.totalorder %s2759_s10, %s2473_s1 }
  0x6e   : > { %p2470_p8 = pnand %p2468_p5, %p2456_p11  ;;  %p2476_p6 = scmp.lt.s32.totalorder %s2474_s20, %s2467_s29 }
  0x70   : > { %p2471_p7 = pneg %p2470_p8  ;;  %p2477_p1 = por %p2476_p6, %p2475_p10 }
  0x72   : > { %p2478_p3 = pnand %p2477_p1, %p2471_p7 }
  0x74   : > { %2481 = shalt.err (!%p2478_p3)
}
  0x75   : > { %s3004_s17 = smov 8   ;;  %s3005_s21 = smov 128  }
  0x76   : > { %2113 = dma.hbm_to_vmem [thread:$0]  (!%p2755_p9), %s2753_s23, 256, %s2759_s10, %s2761_s12, %s3005_s21, %s3005_s21, %s3004_s17  }
  0x77   : > { %p3006_p8 = scmp.ne.s32.totalorder %s2995_s8, 0 }
  0x78   : > { %s2788_s18 = sand.u32 (!%p3006_p8), 1, %s2550_s25   ;;  %p3007_p3 = scmp.ne.s32.totalorder (!%p3006_p8), %s3000_s16, 0 }
  0x79   : > { %311 = sbr.rel (%p3006_p8) target bundleno = 2616 (0xa38), region = 48  ;;  %s1834_s1 = sshll.u32 (!%p3006_p8), %s2788_s18, 4 }
  0x7a   : > { %s314_s19 = scalar_lea.sflag (!%p3006_p8), [#allocation3], %s2788_s18  ;;  %s2794_s11 = scalar_lea.vmem (!%p3006_p8), [#allocation2], %s1834_s1 }
  0x7e   : > { %2525 = dma.done.wait (%p3007_p3), %s314_s19, 256  }
  0x7f   : > { %2527 = vsyncadd (%p3007_p3), %s314_s19, 4294967040  ;;  %p3008_p1 = scmp.eq.s32.totalorder %s2642_s30, 0 }
  0x81   : > { %2529 = dma.done.wait (%p3008_p1), [#allocation6], 4096   ;;  %p3009_p6 = pmov %p3008_p1 }
  0x82   : > { %p3010_p9 = pmov %p3008_p1 }
  0x83   : > { %2531 = vsyncadd (%p3009_p6), [#allocation6], 4294963200 }
  0x84   : > { %2533 = dma.done.wait (%p3010_p9), [#allocation9], 2176   ;;  %p3011_p11 = pmov %p3008_p1 }
  0x85   : > { %p3012_p12 = pmov %p3008_p1 }
  0x86   : > { %2535 = vsyncadd (%p3011_p11), [#allocation9], 4294965120 }
  0x87   : > { %2537 = dma.done.wait (%p3012_p12), [#allocation12], 2048   ;;  %p3013_p13 = pmov %p3008_p1 }
  0x88   : > { %v2572_v0 = vmov 0   ;;  %v2573_v1 = vmov 0.0   ;;  %v2196_v2 = vld [vmem:[#allocation5 + $0xac] ss:$12 sps:$4 sm:$0xff]   ;;  %v2198_v3 = vld [vmem:[#allocation5 + $0xa8] ss:$12 sps:$4 sm:$0xff]  }
  0x89   : > { %2539 = vsyncadd (%p3013_p13), [#allocation12], 4294965248  ;;  %564 = vmatprep.mubr.bf16.mxu0 %v2572_v0  ;;  %1982 = vmatprep.subr.bf16.mxu1 %v2573_v1  ;;  %v2199_v4 = vld [vmem:[#allocation5 + $0x94] ss:$12 sps:$4 sm:$0xff]   ;;  %v2201_v5 = vld [vmem:[#allocation5 + $0x90] ss:$12 sps:$4 sm:$0xff]  }
  0x8a   : > { %532 = vmatprep.subr.bf16.mxu0 %v2196_v2  ;;  %v2202_v6 = vld [vmem:[#allocation5 + $0x7c] ss:$12 sps:$4 sm:$0xff]   ;;  %v2204_v7 = vld [vmem:[#allocation5 + $0x78] ss:$12 sps:$4 sm:$0xff]   ;;  %v2207_v9 = vld [vmem:[#allocation5 + $0x60] ss:$12 sps:$4 sm:$0xff]  }
  0x8b   : > { %533 = vmatpush1.bf16.msra.mxu0 %v2198_v3  ;;  %v2205_v8 = vld [vmem:[#allocation5 + $0x64] ss:$12 sps:$4 sm:$0xff]   ;;  %v2208_v10 = vld [vmem:[#allocation5 + $0x4c] ss:$12 sps:$4 sm:$0xff]   ;;  %v2210_v13 = vld [vmem:[#allocation5 + $0x48] ss:$12 sps:$4 sm:$0xff]  }
  0x8c   : > { %534 = vmatprep.subr.bf16.mxu0 %v2199_v4  ;;  %v2220_v11 = vld [vmem:[#allocation5 + $0xb0] ss:$12 sps:$4 sm:$0xff]   ;;  %v2221_v12 = vld [vmem:[#allocation5 + $0x98] ss:$12 sps:$4 sm:$0xff]   ;;  %v2211_v14 = vld [vmem:[#allocation5 + $0x34] ss:$12 sps:$4 sm:$0xff]  }
  0x8d   : > { %1983 = vmatpush3.bf16.msra.mxu1 %v2220_v11  ;;  %v2213_v15 = vld [vmem:[#allocation5 + $0x30] ss:$12 sps:$4 sm:$0xff]   ;;  %v2222_v16 = vld [vmem:[#allocation5 + $0x80] ss:$12 sps:$4 sm:$0xff]   ;;  %v2223_v18 = vld [vmem:[#allocation5 + $0x68] ss:$12 sps:$4 sm:$0xff]  }
  0x8e   : > { %1984 = vmatprep.subr.bf16.mxu1 %v2573_v1  ;;  %v2214_v17 = vld [vmem:[#allocation5 + $0x1c] ss:$12 sps:$4 sm:$0xff]   ;;  %v2216_v19 = vld [vmem:[#allocation5 + $0x18] ss:$12 sps:$4 sm:$0xff]   ;;  %v2219_v22 = vld [vmem:[#allocation5] ss:$12 sps:$4 sm:$0xff]  }
  0x8f   : > { %535 = vmatpush1.bf16.msra.mxu0 %v2201_v5  ;;  %v2217_v20 = vld [vmem:[#allocation5 + $0x4] ss:$12 sps:$4 sm:$0xff]   ;;  %v2821_v24 = vld [vmem:[%s2794_s11 + $0x8] sm:$0xff]  ;;  %vm2574_vm0 = vmmov 0   ;;  %vm643_vm1 = vcmask 261120   ;;  %s2575_s8 = smov 64  }
  0x90   : > { %536 = vmatprep.subr.bf16.mxu0 %v2202_v6  ;;  %v2224_v21 = vld [vmem:[#allocation5 + $0x50] ss:$12 sps:$4 sm:$0xff]   ;;  %v2225_v25 = vld [vmem:[#allocation5 + $0x38] ss:$12 sps:$4 sm:$0xff]   ;;  %v2226_v27 = vld [vmem:[#allocation5 + $0x20] ss:$12 sps:$4 sm:$0xff]   ;;  %1998 = vmatprep.mubr.msk.bf16.mxu1 %vm2574_vm0, %v2573_v1 }
  0x91   : > { %1985 = vmatpush3.bf16.msra.mxu1 %v2221_v12  ;;  %v2818_v23 = vld [vmem:[%s2794_s11] sm:$0xff]  ;;  %s2576_s16 = smov 96   ;;  %s2577_s23 = smov 32   ;;  %vm832_vm2 = vcmask 130048   ;;  %vm1127_vm3 = vcmask 523264   ;;  %vm1130_vm4 = vcmask 785408  }
  0x92   : > { %1986 = vmatprep.subr.bf16.mxu1 %v2573_v1  ;;  %v371_v26 = vpack.c.bf16 %v2821_v24, %v2818_v23  ;;  %v2227_v28 = vld [vmem:[#allocation5 + $0x8] ss:$12 sps:$4 sm:$0xff]   ;;  %s1925_s22 = sshll.u32 %s2642_s30, 8  ;;  %s367_s9 = scalar_lea.vmem [#allocation13], %s1834_s1 }
  0x93   : > { %537 = vmatpush1.bf16.msra.mxu0 %v2204_v7  ;;  %s1701_s29 = sshll.u32 %s367_s9, 4  ;;  %s2935_s21 = scalar_lea.hbm %s2987_s7, %s1925_s22  ;;  %s2937_s29 = int_to_ptr.vmem [resolvable:$true] %s1701_s29 }
  0x94   : > { %538 = vmatprep.subr.bf16.mxu0 %v2205_v8  ;;  %s1688_s19 = scalar_lea.sflag [#allocation4], %s2788_s18  ;;  %s2482_s11 = scalar_lea.vmem %s2937_s29, 256 }
  0x95   : > { %1987 = vmatpush3.bf16.msra.mxu1 %v2222_v16  ;;  %p2483_p0 = scmp.ne.s32.totalorder %s2937_s29, %s2482_s11  ;;  %p3014_p4 = scmp.ne.s32.totalorder %s3001_s28, 0 }
  0x96   : > { %1988 = vmatprep.subr.bf16.mxu1 %v2573_v1  ;;  %s2578_s30 = smov [#allocation13]  }
  0x97   : > { %539 = vmatpush1.bf16.msra.mxu0 %v2207_v9  ;;  %p2484_p2 = pnand %p2483_p0, %p3014_p4  ;;  %s2486_s1 = sshll.u32 %s2578_s30, 4  ;;  %s2487_s1 = int_to_ptr.vmem [resolvable:$false] %s2486_s1 }
  0x98   : > { %540 = vmatprep.subr.bf16.mxu0 %v2208_v10  ;;  %p2489_p7 = scmp.lt.s32.totalorder %s2937_s29, %s2487_s1 }
  0x99   : > { %1989 = vmatpush3.bf16.msra.mxu1 %v2223_v18  ;;  %p2485_p5 = pneg %p2484_p2 }
  0x9a   : > { %1990 = vmatprep.subr.bf16.mxu1 %v2573_v1 }
  0x9b   : > { %541 = vmatpush1.bf16.msra.mxu0 %v2210_v13 }
  0x9c   : > { %542 = vmatprep.subr.bf16.mxu0 %v2211_v14 }
  0x9d   : > { %1991 = vmatpush3.bf16.msra.mxu1 %v2224_v21 }
  0x9e   : > { %1992 = vmatprep.subr.bf16.mxu1 %v2573_v1 }
  0x9f   : > { %543 = vmatpush1.bf16.msra.mxu0 %v2213_v15 }
  0xa0   : > { %544 = vmatprep.subr.bf16.mxu0 %v2214_v17 }
  0xa1   : > { %1993 = vmatpush3.bf16.msra.mxu1 %v2225_v25 }
  0xa2   : > { %1994 = vmatprep.subr.bf16.mxu1 %v2573_v1 }
  0xa3   : > { %545 = vmatpush1.bf16.msra.mxu0 %v2216_v19 }
  0xa4   : > { %546 = vmatprep.subr.bf16.mxu0 %v2217_v20 }
  0xa5   : > { %1995 = vmatpush3.bf16.msra.mxu1 %v2226_v27 }
  0xa6   : > { %1996 = vmatprep.subr.bf16.mxu1 %v2573_v1 }
  0xa7   : > { %547 = vmatpush1.bf16.msra.mxu0 %v2219_v22 }
  0xa8   : > { %2026 = vmatprep.subr.bf16.mxu0 %v2573_v1 }
  0xa9   : > { %1997 = vmatpush3.bf16.msra.mxu1 %v2227_v28 }
  0xaa   : > { %565 = vmatmul.mubr.bf16.vlgmr.msra.gmra.mxu0 %v371_v26  ;;  %2002 = vmatprep.subr.bf16.mxu1 %v2573_v1 }
  0xab   : > { %2028 = vmatprep.mubr.msk.bf16.mxu0 %vm2574_vm0, %v2573_v1 }
  0xac   : > { %1999 = vmatmul.mubr.bf16.vlgmr.msra.gmra.mxu1 %v371_v26 }
  0xad   : > { %2004 = vmatprep.mubr.msk.bf16.mxu1 %vm2574_vm0, %v2573_v1 }
 0x16a   : > { %v566_v29 = vpop.f32.mrf.mxu0 }
 0x16c   : > { %v568_v30 = vpop.f32.mrf.mxu0  ;;  %v609_v36 = vpop.f32.mrf.mxu1 }
 0x16e   : > { %v570_v31 = vpop.f32.mrf.mxu0  ;;  %v2000_v37 = vpop.f32.mrf.mxu1 }
 0x16f   : > { %v616_v35 = vpack.c.bf16 %v570_v31, %v566_v29 }
 0x170   : > { %v572_v32 = vpop.f32.mrf.mxu0  ;;  %v612_v38 = vpop.f32.mrf.mxu1 }
 0x171   : > { %v617_v33 = vpack.c.bf16 %v572_v32, %v568_v30  ;;  %v2848_v39 = vpack.c.bf16 %v612_v38, %v609_v36 }
 0x172   : > { %v2001_v40 = vpop.f32.mrf.mxu1 }
 0x173   : > { %629 = vrot.lane.b32.xlu1 %v617_v33, %s2575_s8  ;;  %627 = vrot.lane.b32.xlu0 %v617_v33, %s2576_s16  ;;  %v648_v34 = vsel %vm643_vm1, %v617_v33, 0 }
 0x174   : > { %2003 = vmatpush3.bf16.xpose.msra.mxu1 %v648_v34  ;;  %2027 = vmatpush3.bf16.msra.mxu0 %v2848_v39 }
 0x175   : > { %2008 = vmatprep.subr.bf16.mxu1 %v2573_v1  ;;  %2038 = vmatprep.subr.bf16.mxu0 %v2573_v1 }
 0x177   : > { %622 = vrot.lane.b32.xlu1 %v616_v35, %s2575_s8  ;;  %620 = vrot.lane.b32.xlu0 %v616_v35, %s2576_s16 }
 0x17b   : > { %624 = vrot.lane.b32.xlu1 %v616_v35, %s2577_s23  ;;  %631 = vrot.lane.b32.xlu0 %v617_v33, %s2577_s23 }
 0x17c   : > { %2005 = vmatmul.mubr.msk.bf16.vlgmr.msra.gmra.mxu1 %vm643_vm1, %v616_v35 }
 0x17d   : > { %2010 = vmatprep.mubr.msk.bf16.mxu1 %vm2574_vm0, %v2573_v1 }
 0x1e5   : > { %v628_v41 = vpop.permute.xlu0 %627  ;;  %v630_v43 = vpop.permute.xlu1 %629 }
 0x1e6   : > { %v695_v42 = vsel %vm643_vm1, %v628_v41, 0  ;;  %v742_v45 = vsel %vm643_vm1, %v630_v43, 0 }
 0x1e7   : > { %2009 = vmatpush3.bf16.xpose.msra.mxu1 %v695_v42 }
 0x1e8   : > { %2014 = vmatprep.subr.bf16.mxu1 %v2573_v1 }
 0x1e9   : > { %v621_v44 = vpop.permute.xlu0 %620  ;;  %v623_v47 = vpop.permute.xlu1 %622 }
 0x1ed   : > { %v632_v46 = vpop.permute.xlu0 %631  ;;  %v625_v49 = vpop.permute.xlu1 %624 }
 0x1ee   : > { %2011 = vmatmul.mubr.msk.bf16.vlgmr.msra.gmra.mxu1 %vm643_vm1, %v621_v44  ;;  %v789_v48 = vsel %vm643_vm1, %v632_v46, 0 }
 0x1ef   : > { %2015 = vmatpush3.bf16.xpose.msra.mxu1 %v742_v45  ;;  %2016 = vmatprep.mubr.msk.bf16.mxu1 %vm2574_vm0, %v2573_v1 }
 0x1f0   : > { %2020 = vmatprep.subr.bf16.mxu1 %v2573_v1 }
 0x1f6   : > { %2017 = vmatmul.mubr.msk.bf16.vlgmr.msra.gmra.mxu1 %vm643_vm1, %v623_v47 }
 0x1f7   : > { %2021 = vmatpush3.bf16.xpose.msra.mxu1 %v789_v48  ;;  %2022 = vmatprep.mubr.msk.bf16.mxu1 %vm2574_vm0, %v2573_v1 }
 0x1f8   : > { %2032 = vmatprep.subr.bf16.mxu1 %v2573_v1 }
 0x1fe   : > { %2023 = vmatmul.mubr.msk.bf16.vlgmr.msra.gmra.mxu1 %vm643_vm1, %v625_v49 }
 0x1ff   : > { %2034 = vmatprep.mubr.msk.bf16.mxu1 %vm2574_vm0, %v2573_v1 }
 0x23c   : > { %v684_v50 = vpop.f32.mrf.mxu1 }
 0x23d   : > { %v833_v51 = vsel %vm832_vm2, %v684_v50, -inf }
 0x23e   : > { %834 = vmax.xlane.f32.xlu0 %v833_v51  ;;  %v2006_v52 = vpop.f32.mrf.mxu1 }
 0x240   : > { %v687_v53 = vpop.f32.mrf.mxu1 }
 0x241   : > { %v836_v54 = vsel %vm832_vm2, %v687_v53, -inf }
 0x242   : > { %837 = vmax.xlane.f32.xlu1 %v836_v54  ;;  %v2007_v55 = vpop.f32.mrf.mxu1 }
 0x2ae   : > { %v731_v56 = vpop.f32.mrf.mxu1 }
 0x2af   : > { %v839_v57 = vsel %vm832_vm2, %v731_v56, -inf }
 0x2b0   : > { %840 = vmax.xlane.f32.xlu0 %v839_v57  ;;  %v2012_v58 = vpop.f32.mrf.mxu1 }
 0x2b2   : > { %v734_v59 = vpop.f32.mrf.mxu1 }
 0x2b3   : > { %v842_v60 = vsel %vm832_vm2, %v734_v59, -inf }
 0x2b4   : > { %843 = vmax.xlane.f32.xlu0 %v842_v60  ;;  %v2013_v61 = vpop.f32.mrf.mxu1 }
 0x2b6   : > { %v778_v62 = vpop.f32.mrf.mxu1 }
 0x2b7   : > { %v845_v63 = vsel %vm832_vm2, %v778_v62, -inf }
 0x2b8   : > { %846 = vmax.xlane.f32.xlu1 %v845_v63  ;;  %v2018_v2 = vpop.f32.mrf.mxu1 }
 0x2ba   : > { %v781_v3 = vpop.f32.mrf.mxu1 }
 0x2bb   : > { %v848_v4 = vsel %vm832_vm2, %v781_v3, -inf }
 0x2bc   : > { %849 = vmax.xlane.f32.xlu0 %v848_v4  ;;  %v2019_v5 = vpop.f32.mrf.mxu1 }
 0x2be   : > { %v825_v6 = vpop.f32.mrf.mxu1 }
 0x2bf   : > { %v851_v7 = vsel %vm832_vm2, %v825_v6, -inf }
 0x2c0   : > { %852 = vmax.xlane.f32.xlu1 %v851_v7  ;;  %v2024_v8 = vpop.f32.mrf.mxu1 }
 0x2c2   : > { %v828_v9 = vpop.f32.mrf.mxu1 }
 0x2c3   : > { %v854_v10 = vsel %vm832_vm2, %v828_v9, -inf }
 0x2c4   : > { %855 = vmax.xlane.f32.xlu0 %v854_v10  ;;  %v2025_v11 = vpop.f32.mrf.mxu1 }
 0x2c7   : > { %v835_v15 = vpop.xlane.xlu0 %834 }
 0x2c8   : > { %v857_v16 = vsub.f32 %v684_v50, %v835_v15 }
 0x2ca   : > { %v865_v19 = vmul.f32 1.442695, %v857_v16 }
 0x2cb   : > { %v838_v12 = vpop.xlane.xlu1 %837 }
 0x2cc   : > { %v858_v13 = vsub.f32 %v687_v53, %v838_v12 }
 0x2ce   : > { %v867_v14 = vmul.f32 1.442695, %v858_v13 }
 0x2d0   : > { %2276 = vpow2.f32 %v867_v14 }
 0x2d1   : > { %634 = vrot.lane.b32.xlu1 %v2848_v39, %s2576_s16  ;;  %2278 = vpow2.f32 %v865_v19 }
 0x2dd   : > { %v2277_v17 = vpop.eup %2276 }
 0x2de   : > { %v884_v18 = vsel %vm832_vm2, %v2277_v17, 0.0  ;;  %v2279_v20 = vpop.eup %2278 }
 0x2df   : > { %885 = vadd.xlane.f32.xlu0 %v884_v18  ;;  %v881_v21 = vsel %vm832_vm2, %v2279_v20, 0.0 }
 0x2f5   : > { %882 = vadd.xlane.f32.xlu1 %v881_v21 }
 0x339   : > { %v841_v22 = vpop.xlane.xlu0 %840 }
 0x33a   : > { %v859_v25 = vsub.f32 %v731_v56, %v841_v22 }
 0x33c   : > { %v869_v26 = vmul.f32 1.442695, %v859_v25  ;;  %v2228_v25 = vld [vmem:[#allocation7 + $0x38] sm:$0xff]  }
 0x33d   : > { %v844_v27 = vpop.xlane.xlu0 %843 }
 0x33e   : > { %2280 = vpow2.f32 %v869_v26  ;;  %v860_v28 = vsub.f32 %v734_v59, %v844_v27  ;;  %v2229_v26 = vld [vmem:[#allocation7 + $0x30] sm:$0xff]   ;;  %v2230_v27 = vld [vmem:[#allocation7 + $0x28] sm:$0xff]  }
 0x340   : > { %v871_v29 = vmul.f32 1.442695, %v860_v28 }
 0x341   : > { %v847_v30 = vpop.xlane.xlu1 %846 }
 0x342   : > { %2282 = vpow2.f32 %v871_v29  ;;  %v861_v31 = vsub.f32 %v778_v62, %v847_v30 }
 0x344   : > { %v873_v32 = vmul.f32 1.442695, %v861_v31 }
 0x345   : > { %v850_v33 = vpop.xlane.xlu0 %849 }
 0x346   : > { %2284 = vpow2.f32 %v873_v32  ;;  %v862_v34 = vsub.f32 %v781_v3, %v850_v33  ;;  %v2231_v32 = vld [vmem:[#allocation7 + $0x20] sm:$0xff]   ;;  %v2232_v33 = vld [vmem:[#allocation7 + $0x18] sm:$0xff]  }
 0x348   : > { %v875_v35 = vmul.f32 1.442695, %v862_v34 }
 0x349   : > { %v853_v36 = vpop.xlane.xlu1 %852 }
 0x34a   : > { %2286 = vpow2.f32 %v875_v35  ;;  %v863_v37 = vsub.f32 %v825_v6, %v853_v36  ;;  %v2233_v35 = vld [vmem:[#allocation7 + $0x10] sm:$0xff]  }
 0x34b   : > { %v2281_v38 = vpop.eup %2280 }
 0x34c   : > { %v877_v40 = vmul.f32 1.442695, %v863_v37  ;;  %v887_v41 = vsel %vm832_vm2, %v2281_v38, 0.0 }
 0x34d   : > { %888 = vadd.xlane.f32.xlu1 %v887_v41  ;;  %v635_v42 = vpop.permute.xlu1 %634  ;;  %v856_v43 = vpop.xlane.xlu0 %855 }
 0x34e   : > { %2288 = vpow2.f32 %v877_v40  ;;  %v864_v44 = vsub.f32 %v828_v9, %v856_v43  ;;  %2033 = vmatpush3.bf16.msra.mxu1 %v635_v42  ;;  %v2235_v43 = vld [vmem:[#allocation7] sm:$0xff]  }
 0x34f   : > { %v2283_v45 = vpop.eup %2282  ;;  %2044 = vmatprep.subr.bf16.mxu1 %v2573_v1 }
 0x350   : > { %v879_v46 = vmul.f32 1.442695, %v864_v44  ;;  %v890_v47 = vsel %vm832_vm2, %v2283_v45, 0.0 }
 0x351   : > { %891 = vadd.xlane.f32.xlu0 %v890_v47 }
 0x352   : > { %2290 = vpow2.f32 %v879_v46 }
 0x353   : > { %v2285_v48 = vpop.eup %2284 }
 0x354   : > { %v893_v49 = vsel %vm832_vm2, %v2285_v48, 0.0 }
 0x355   : > { %894 = vadd.xlane.f32.xlu1 %v893_v49 }
 0x357   : > { %v2287_v50 = vpop.eup %2286 }
 0x358   : > { %v896_v51 = vsel %vm832_vm2, %v2287_v50, 0.0 }
 0x359   : > { %897 = vadd.xlane.f32.xlu0 %v896_v51 }
 0x35b   : > { %v2289_v52 = vpop.eup %2288 }
 0x35c   : > { %v899_v53 = vsel %vm832_vm2, %v2289_v52, 0.0 }
 0x35d   : > { %900 = vadd.xlane.f32.xlu1 %v899_v53 }
 0x35f   : > { %v2291_v54 = vpop.eup %2290 }
 0x360   : > { %v902_v55 = vsel %vm832_vm2, %v2291_v54, 0.0 }
 0x361   : > { %903 = vadd.xlane.f32.xlu0 %v902_v55 }
 0x368   : > { %v886_v56 = vpop.xlane.xlu0 %885 }
 0x369   : > { %2292 = vrcp.f32 %v886_v56 }
 0x36e   : > { %640 = vrot.lane.b32.xlu1 %v2848_v39, %s2577_s23 }
 0x376   : > { %v2293_v58 = vpop.eup %2292 }
 0x377   : > { %637 = vrot.lane.b32.xlu0 %v2848_v39, %s2575_s8  ;;  %v914_v61 = vmul.f32 %v2293_v58, %v2277_v17 }
 0x37e   : > { %v883_v57 = vpop.xlane.xlu1 %882 }
 0x37f   : > { %2294 = vrcp.f32 %v883_v57 }
 0x38c   : > { %v2295_v59 = vpop.eup %2294 }
 0x38d   : > { %v913_v60 = vmul.f32 %v2295_v59, %v2279_v20 }
 0x38f   : > { %v921_v62 = vpack.c.bf16 %v914_v61, %v913_v60 }
 0x391   : > { %2029 = vmatmul.mubr.msk.bf16.vlgmr.msra.gmra.mxu0 %vm832_vm2, %v921_v62 }
 0x392   : > { %2040 = vmatprep.mubr.msk.bf16.mxu0 %vm2574_vm0, %v2573_v1 }
 0x3d6   : > { %v889_v63 = vpop.xlane.xlu1 %888 }
 0x3d7   : > { %2296 = vrcp.f32 %v889_v63 }
 0x3da   : > { %v892_v2 = vpop.xlane.xlu0 %891 }
 0x3db   : > { %2298 = vrcp.f32 %v892_v2 }
 0x3de   : > { %v895_v3 = vpop.xlane.xlu1 %894 }
 0x3df   : > { %2300 = vrcp.f32 %v895_v3 }
 0x3e2   : > { %v898_v39 = vpop.xlane.xlu0 %897 }
 0x3e3   : > { %2302 = vrcp.f32 %v898_v39 }
 0x3e4   : > { %v2297_v4 = vpop.eup %2296 }
 0x3e5   : > { %v915_v7 = vmul.f32 %v2297_v4, %v2281_v38  ;;  %v2234_v38 = vld [vmem:[#allocation7 + $0x8] sm:$0xff]   ;;  %v1873_v4 = vld [vmem:[#allocation8] ss:$0 sm:$0xff] }
 0x3e6   : > { %v901_v5 = vpop.xlane.xlu1 %900 }
 0x3e7   : > { %2304 = vrcp.f32 %v901_v5 }
 0x3e8   : > { %v2299_v6 = vpop.eup %2298 }
 0x3e9   : > { %v916_v8 = vmul.f32 %v2299_v6, %v2283_v45 }
 0x3ea   : > { %v904_v9 = vpop.xlane.xlu0 %903  ;;  %v641_v11 = vpop.permute.xlu1 %640 }
 0x3eb   : > { %2306 = vrcp.f32 %v904_v9  ;;  %v922_v10 = vpack.c.bf16 %v916_v8, %v915_v7 }
 0x3ec   : > { %v2301_v12 = vpop.eup %2300 }
 0x3ed   : > { %2035 = vmatmul.mubr.msk.bf16.vlgmr.msra.gmra.mxu1 %vm832_vm2, %v922_v10  ;;  %v917_v15 = vmul.f32 %v2301_v12, %v2285_v48 }
 0x3ee   : > { %2045 = vmatpush3.bf16.msra.mxu1 %v641_v11  ;;  %v638_v13 = vpop.permute.xlu0 %637  ;;  %2046 = vmatprep.mubr.msk.bf16.mxu1 %vm2574_vm0, %v2573_v1 }
 0x3ef   : > { %2039 = vmatpush3.bf16.msra.mxu0 %v638_v13 }
 0x3f0   : > { %v2303_v14 = vpop.eup %2302  ;;  %2050 = vmatprep.subr.bf16.mxu0 %v2573_v1 }
 0x3f1   : > { %v918_v16 = vmul.f32 %v2303_v14, %v2287_v50 }
 0x3f3   : > { %v923_v17 = vpack.c.bf16 %v918_v16, %v917_v15 }
 0x3f4   : > { %v2305_v18 = vpop.eup %2304 }
 0x3f5   : > { %2041 = vmatmul.mubr.msk.bf16.vlgmr.msra.gmra.mxu0 %vm832_vm2, %v923_v17  ;;  %v919_v20 = vmul.f32 %v2305_v18, %v2289_v52 }
 0x3f6   : > { %2066 = vmatprep.mubr.msk.bf16.mxu0 %vm2574_vm0, %v2573_v1  ;;  %2051 = vmatpush3.bf16.msra.mxu0 %v2228_v25  ;;  %v2244_v25 = vld [vmem:[#allocation10 + $0x54] ss:$8 sps:$4 sm:$0xff]  }
 0x3f7   : > { %2052 = vmatprep.subr.bf16.mxu0 %v2573_v1 }
 0x3f8   : > { %v2307_v19 = vpop.eup %2306 }
 0x3f9   : > { %v920_v21 = vmul.f32 %v2307_v19, %v2291_v54 }
 0x3fa   : > { %2053 = vmatpush3.bf16.msra.mxu0 %v2229_v26  ;;  %v2242_v26 = vld [vmem:[#allocation10 + $0x50] ss:$8 sps:$4 sm:$0xff]  }
 0x3fb   : > { %v924_v22 = vpack.c.bf16 %v920_v21, %v919_v20  ;;  %2054 = vmatprep.subr.bf16.mxu0 %v2573_v1  ;;  %v2238_v20 = vld [vmem:[#allocation10 + $0x74] ss:$8 sps:$4 sm:$0xff]   ;;  %v2236_v21 = vld [vmem:[#allocation10 + $0x70] ss:$8 sps:$4 sm:$0xff]  }
 0x3fc   : > { %1408 = vmatprep.subr.bf16.mxu1 %v2238_v20 }
 0x3fd   : > { %2047 = vmatmul.mubr.msk.bf16.vlgmr.msra.gmra.mxu1 %vm832_vm2, %v924_v22  ;;  %v2239_v22 = vld [vmem:[#allocation10 + $0x60] ss:$8 sps:$4 sm:$0xff]  }
 0x3fe   : > { %1440 = vmatprep.mubr.bf16.mxu1 %v2572_v0  ;;  %2055 = vmatpush3.bf16.msra.mxu0 %v2230_v27  ;;  %v2245_v27 = vld [vmem:[#allocation10 + $0x40] ss:$8 sps:$4 sm:$0xff]  }
 0x3ff   : > { %2056 = vmatprep.subr.bf16.mxu0 %v2573_v1  ;;  %1409 = vmatpush1.bf16.msra.mxu1 %v2236_v21 }
 0x402   : > { %2057 = vmatpush3.bf16.msra.mxu0 %v2231_v32  ;;  %v2251_v32 = vld [vmem:[#allocation10 + $0x20] ss:$8 sps:$4 sm:$0xff]  }
 0x403   : > { %2058 = vmatprep.subr.bf16.mxu0 %v2573_v1 }
 0x406   : > { %2059 = vmatpush3.bf16.msra.mxu0 %v2232_v33  ;;  %v2256_v33 = vld [vmem:[#allocation10 + $0x14] ss:$8 sps:$4 sm:$0xff]  }
 0x407   : > { %2060 = vmatprep.subr.bf16.mxu0 %v2573_v1 }
 0x40a   : > { %2061 = vmatpush3.bf16.msra.mxu0 %v2233_v35  ;;  %v2257_v35 = vld [vmem:[#allocation10] ss:$8 sps:$4 sm:$0xff]  }
 0x40b   : > { %2062 = vmatprep.subr.bf16.mxu0 %v2573_v1 }
 0x40e   : > { %2063 = vmatpush3.bf16.msra.mxu0 %v2234_v38  ;;  %v2262_v38 = vld [vmem:[#allocation11 + $0x70] sm:$0xff]  }
 0x40f   : > { %2064 = vmatprep.subr.bf16.mxu0 %v2573_v1 }
 0x412   : > { %2065 = vmatpush3.bf16.msra.mxu0 %v2235_v43  ;;  %v2266_v43 = vld [vmem:[#allocation11 + $0x60] sm:$0xff]  }
 0x451   : > { %v962_v28 = vpop.f32.mrf.mxu0 }
 0x453   : > { %v2030_v29 = vpop.f32.mrf.mxu0 }
 0x454   : > { %v2250_v29 = vld [vmem:[#allocation10 + $0x34] ss:$8 sps:$4 sm:$0xff]  }
 0x455   : > { %v965_v30 = vpop.f32.mrf.mxu0 }
 0x457   : > { %v2031_v31 = vpop.f32.mrf.mxu0 }
 0x458   : > { %v2253_v31 = vld [vmem:[#allocation10 + $0x24] ss:$8 sps:$4 sm:$0xff]  }
 0x4ad   : > { %v1006_v0 = vpop.f32.mrf.mxu1 }
 0x4af   : > { %v2036_v34 = vpop.f32.mrf.mxu1 }
 0x4b0   : > { %v2259_v34 = vld [vmem:[#allocation10 + $0x4] ss:$8 sps:$4 sm:$0xff]  }
 0x4b1   : > { %v1009_v36 = vpop.f32.mrf.mxu1 }
 0x4b2   : > { %v2181_v37 = vpack.i.bf16 %v1009_v36, %v1006_v0  ;;  %v2254_v0 = vld [vmem:[#allocation10 + $0x10] ss:$8 sps:$4 sm:$0xff]  }
 0x4b3   : > { %v2037_v40 = vpop.f32.mrf.mxu1  ;;  %v2260_v36 = vld [vmem:[#allocation11 + $0x78] sm:$0xff]  }
 0x4b4   : > { %2182 = vrot.lane.b32.xlu1 %v2181_v37, %s2577_s23  ;;  %v2261_v37 = vld [vmem:[#allocation11 + $0x38] sm:$0xff]   ;;  %1960 = vmatprep.subr.bf16.mxu0 %v2260_v36  ;;  %v2263_v40 = vld [vmem:[#allocation11 + $0x30] sm:$0xff]  }
 0x4b5   : > { %v1050_v41 = vpop.f32.mrf.mxu0 }
 0x4b7   : > { %v2042_v42 = vpop.f32.mrf.mxu0 }
 0x4b8   : > { %v2265_v42 = vld [vmem:[#allocation11 + $0x28] sm:$0xff]  }
 0x4b9   : > { %v1053_v44 = vpop.f32.mrf.mxu0 }
 0x4ba   : > { %v2186_v45 = vpack.i.bf16 %v1053_v44, %v1050_v41  ;;  %v2264_v41 = vld [vmem:[#allocation11 + $0x68] sm:$0xff]   ;;  %v2267_v44 = vld [vmem:[#allocation11 + $0x20] sm:$0xff]  }
 0x4bb   : > { %v2043_v46 = vpop.f32.mrf.mxu0 }
 0x4bc   : > { %2187 = vrot.lane.b32.xlu0 %v2186_v45, %s2575_s8  ;;  %v2268_v45 = vld [vmem:[#allocation11 + $0x58] sm:$0xff]   ;;  %s2488_s8 = scalar_lea.vmem %s2487_s1, 512 }
 0x4bd   : > { %v1094_v47 = vpop.f32.mrf.mxu1  ;;  %v2269_v46 = vld [vmem:[#allocation11 + $0x18] sm:$0xff]   ;;  %p2490_p10 = scmp.lt.s32.totalorder %s2488_s8, %s2482_s11 }
 0x4bf   : > { %v2048_v48 = vpop.f32.mrf.mxu1  ;;  %p2491_p8 = por %p2490_p10, %p2489_p7 }
 0x4c1   : > { %v1097_v49 = vpop.f32.mrf.mxu1  ;;  %p2492_p3 = pnand %p2491_p8, %p2485_p5 }
 0x4c2   : > { %v2191_v50 = vpack.i.bf16 %v1097_v49, %v1094_v47 }
 0x4c3   : > { %v2049_v51 = vpop.f32.mrf.mxu1 }
 0x4c4   : > { %2192 = vrot.lane.b32.xlu1 %v2191_v50, %s2576_s16 }
 0x526   : > { %v2183_v52 = vpop.permute.xlu1 %2182 }
 0x527   : > { %v2185_v54 = vunpack.i.h.bf16 %v2183_v52  ;;  %v2184_v55 = vunpack.i.l.bf16 %v2183_v52 }
 0x529   : > { %v1126_v58 = vsel %vm643_vm1, %v965_v30, %v2185_v54  ;;  %v1125_v59 = vsel %vm643_vm1, %v962_v28, %v2184_v55  ;;  %v2247_v28 = vld [vmem:[#allocation10 + $0x44] ss:$8 sps:$4 sm:$0xff]   ;;  %v2248_v30 = vld [vmem:[#allocation10 + $0x30] ss:$8 sps:$4 sm:$0xff]  }
 0x52e   : > { %v2188_v53 = vpop.permute.xlu0 %2187 }
 0x52f   : > { %v2190_v56 = vunpack.i.h.bf16 %v2188_v53  ;;  %v2189_v1 = vunpack.i.l.bf16 %v2188_v53 }
 0x531   : > { %v1128_v62 = vsel %vm1127_vm3, %v1125_v59, %v2189_v1  ;;  %v1129_v63 = vsel %vm1127_vm3, %v1126_v58, %v2190_v56 }
 0x536   : > { %v2193_v57 = vpop.permute.xlu1 %2192 }
 0x537   : > { %v2195_v60 = vunpack.i.h.bf16 %v2193_v57  ;;  %v2194_v61 = vunpack.i.l.bf16 %v2193_v57 }
 0x539   : > { %v1132_v2 = vsel %vm1130_vm4, %v1129_v63, %v2195_v60  ;;  %v1131_v3 = vsel %vm1130_vm4, %v1128_v62, %v2194_v61 }
 0x53a   : > { %v1133_v39 = vpack.c.bf16 %v1132_v2, %v1131_v3  ;;  %v1882_v2 = vld [vmem:[#allocation8 + $0x1] ss:$0 sm:$0xff] }
 0x53c   : > { %2067 = vmatmul.mubr.bf16.vlgmr.msra.gmra.mxu0 %v1133_v39 }
 0x53d   : > { %1961 = vmatpush3.bf16.msra.mxu0 %v2261_v37  ;;  %v1900_v37 = vld [vmem:[#allocation8 + $0x3] ss:$0 sm:$0xff] }
 0x53e   : > { %1962 = vmatprep.subr.bf16.mxu0 %v2262_v38 }
 0x541   : > { %1963 = vmatpush3.bf16.msra.mxu0 %v2263_v40 }
 0x542   : > { %1964 = vmatprep.subr.bf16.mxu0 %v2264_v41 }
 0x545   : > { %1965 = vmatpush3.bf16.msra.mxu0 %v2265_v42 }
 0x546   : > { %1966 = vmatprep.subr.bf16.mxu0 %v2266_v43 }
 0x549   : > { %1967 = vmatpush3.bf16.msra.mxu0 %v2267_v44 }
 0x54a   : > { %1968 = vmatprep.subr.bf16.mxu0 %v2268_v45 }
 0x54d   : > { %1969 = vmatpush3.bf16.msra.mxu0 %v2269_v46 }
 0x5fc   : > { %v1237_v5 = vpop.f32.mrf.mxu0 }
 0x5fd   : > { %v1238_v6 = vadd.f32 %v1873_v4, %v1237_v5  ;;  %v1883_v5 = vld [vmem:[#allocation8 + $0x2] ss:$0 sm:$0xff] }
 0x5fe   : > { %v2068_v7 = vpop.f32.mrf.mxu0 }
 0x5ff   : > { %v1244_v8 = vadd.f32 %v1238_v6, %v2818_v23 }
 0x600   : > { %v1240_v9 = vpop.f32.mrf.mxu0 }
 0x601   : > { %v1241_v10 = vadd.f32 %v1873_v4, %v1240_v9  ;;  %1248 = vadd.xlane.f32.xlu0 %v1244_v8 }
 0x602   : > { %v2069_v11 = vpop.f32.mrf.mxu0 }
 0x603   : > { %v1245_v12 = vadd.f32 %v1241_v10, %v2821_v24  ;;  %v2241_v24 = vld [vmem:[#allocation10 + $0x64] ss:$8 sps:$4 sm:$0xff]   ;;  %v2270_v10 = vld [vmem:[#allocation11 + $0x50] sm:$0xff]  }
 0x604   : > { %1410 = vmatprep.subr.bf16.mxu1 %v2241_v24  ;;  %v2271_v11 = vld [vmem:[#allocation11 + $0x10] sm:$0xff]   ;;  %1970 = vmatprep.subr.bf16.mxu0 %v2270_v10 }
 0x605   : > { %1250 = vadd.xlane.f32.xlu1 %v1245_v12  ;;  %1411 = vmatpush1.bf16.msra.mxu1 %v2239_v22 }
 0x606   : > { %1412 = vmatprep.subr.bf16.mxu1 %v2244_v25  ;;  %1971 = vmatpush3.bf16.msra.mxu0 %v2271_v11  ;;  %v1918_v11 = vld [vmem:[#allocation8 + $0x5] ss:$0 sm:$0xff] }
 0x609   : > { %1413 = vmatpush1.bf16.msra.mxu1 %v2242_v26 }
 0x60a   : > { %1414 = vmatprep.subr.bf16.mxu1 %v2247_v28 }
 0x60d   : > { %1415 = vmatpush1.bf16.msra.mxu1 %v2245_v27 }
 0x60e   : > { %1416 = vmatprep.subr.bf16.mxu1 %v2250_v29 }
 0x611   : > { %1417 = vmatpush1.bf16.msra.mxu1 %v2248_v30 }
 0x612   : > { %1418 = vmatprep.subr.bf16.mxu1 %v2253_v31 }
 0x615   : > { %1419 = vmatpush1.bf16.msra.mxu1 %v2251_v32 }
 0x616   : > { %1420 = vmatprep.subr.bf16.mxu1 %v2256_v33 }
 0x619   : > { %1421 = vmatpush1.bf16.msra.mxu1 %v2254_v0 }
 0x61a   : > { %1422 = vmatprep.subr.bf16.mxu1 %v2259_v34 }
 0x61d   : > { %1423 = vmatpush1.bf16.msra.mxu1 %v2257_v35 }
 0x68a   : > { %v1249_v13 = vpop.xlane.xlu0 %1248 }
 0x68b   : > { %v1253_v14 = vmul.f32 0.0078125, %v1249_v13  ;;  %v2273_v13 = vld [vmem:[#allocation11 + $0x8] sm:$0xff]  }
 0x68d   : > { %v2916_v15 = vsub.f32 %v1244_v8, %v1253_v14  ;;  %v2274_v14 = vld [vmem:[#allocation11 + $0x40] sm:$0xff]  }
 0x68e   : > { %v1251_v16 = vpop.xlane.xlu1 %1250 }
 0x68f   : > { %v1254_v17 = vmul.f32 0.0078125, %v1251_v16  ;;  %v1257_v18 = vmul.f32 %v2916_v15, %v2916_v15  ;;  %v1318_v16 = vlaneseq }
 0x691   : > { %v2920_v19 = vsub.f32 %v1245_v12, %v1254_v17  ;;  %1259 = vadd.xlane.f32.xlu0 %v1257_v18  ;;  %v2272_v12 = vld [vmem:[#allocation11 + $0x48] sm:$0xff]   ;;  %v1319_v17 = vshrl.u32 %v1318_v16, 7 }
 0x692   : > { %1972 = vmatprep.subr.bf16.mxu0 %v2272_v12 }
 0x693   : > { %v1258_v23 = vmul.f32 %v2920_v19, %v2920_v19  ;;  %1973 = vmatpush3.bf16.msra.mxu0 %v2273_v13  ;;  %v1324_v18 = vsub.s32 1, %v1319_v17 }
 0x694   : > { %1974 = vmatprep.subr.bf16.mxu0 %v2274_v14 }
 0x695   : > { %1261 = vadd.xlane.f32.xlu0 %v1258_v23  ;;  %v1316_v23 = vld [vmem:[%s2985_s5] sm:$0x3] }
 0x696   : > { %v1325_v21 = vrot.slane %v1316_v23, %v1324_v18 }
 0x71a   : > { %v1260_v47 = vpop.xlane.xlu0 %1259 }
 0x71b   : > { %v1263_v48 = vmul.f32 0.007874016, %v1260_v47 }
 0x71d   : > { %2308 = vrsqrt.f32 %v1263_v48  ;;  %vm1267_vm5 = vcmp.eq.f32.partialorder %v1263_v48, inf  ;;  %v1270_v53 = vand.u32 2147483648, %v1263_v48  ;;  %vm1269_vm6 = vcmp.eq.f32.partialorder %v1263_v48, 0.0 }
 0x71e   : > { %v1262_v49 = vpop.xlane.xlu0 %1261 }
 0x71f   : > { %v1264_v50 = vmul.f32 0.007874016, %v1262_v49 }
 0x721   : > { %2310 = vrsqrt.f32 %v1264_v50  ;;  %vm1274_vm7 = vcmp.eq.f32.partialorder %v1264_v50, inf  ;;  %v1277_v58 = vand.u32 2147483648, %v1264_v50  ;;  %vm1276_vm8 = vcmp.eq.f32.partialorder %v1264_v50, 0.0 }
 0x72a   : > { %v2309_v51 = vpop.eup %2308 }
 0x72b   : > { %v1266_v52 = vmul.f32 %v2309_v51, %v1263_v48 }
 0x72d   : > { %v1268_v54 = vsel %vm1267_vm5, %v1263_v48, %v1266_v52 }
 0x72e   : > { %v2311_v55 = vpop.eup %2310  ;;  %v1271_v56 = vsel %vm1269_vm6, %v1270_v53, %v1268_v54 }
 0x72f   : > { %v1279_v1 = vadd.f32 1e-06, %v1271_v56  ;;  %v1273_v57 = vmul.f32 %v2311_v55, %v1264_v50 }
 0x731   : > { %2312 = vrcp.f32 %v1279_v1  ;;  %v1275_v59 = vsel %vm1274_vm7, %v1264_v50, %v1273_v57 }
 0x732   : > { %v1278_v60 = vsel %vm1276_vm8, %v1277_v58, %v1275_v59 }
 0x733   : > { %v1280_v61 = vadd.f32 1e-06, %v1278_v60 }
 0x735   : > { %2314 = vrcp.f32 %v1280_v61 }
 0x73e   : > { %v2313_v62 = vpop.eup %2312 }
 0x73f   : > { %v1285_v63 = vmul.f32 %v2313_v62, %v2916_v15  ;;  %v2275_v15 = vld [vmem:[#allocation11] sm:$0xff]  }
 0x740   : > { %1975 = vmatpush3.bf16.msra.mxu0 %v2275_v15 }
 0x741   : > { %v1291_v4 = vmul.f32 %v1882_v2, %v1285_v63 }
 0x742   : > { %v2315_v3 = vpop.eup %2314 }
 0x743   : > { %v1286_v39 = vmul.f32 %v2315_v3, %v2920_v19  ;;  %v1297_v7 = vadd.f32 %v1883_v5, %v1291_v4  ;;  %v1320_v19 = vsub.s32 0, %v1319_v17 }
 0x745   : > { %v1292_v6 = vmul.f32 %v1882_v2, %v1286_v39  ;;  %v1321_v24 = vrot.slane %v1316_v23, %v1320_v19 }
 0x747   : > { %v1298_v8 = vadd.f32 %v1883_v5, %v1292_v6 }
 0x749   : > { %v1299_v9 = vpack.c.bf16 %v1298_v8, %v1297_v7 }
 0x74b   : > { %1441 = vmatmul.mubr.bf16.vlgmr.msra.gmra.mxu1 %v1299_v9  ;;  %v1917_v9 = vld [vmem:[#allocation8 + $0x4] ss:$0 sm:$0xff] }
 0x80b   : > { %v1442_v20 = vpop.f32.mrf.mxu1 }
 0x80c   : > { %v1443_v28 = vadd.f32 %v1442_v20, %v1321_v24 }
 0x80d   : > { %v1444_v22 = vpop.f32.mrf.mxu1 }
 0x80e   : > { %v1445_v26 = vadd.f32 %v1444_v22, %v1325_v21  ;;  %v1451_v0 = vmax.f32 %v1443_v28, 0.0 }
 0x80f   : > { %v1446_v25 = vpop.f32.mrf.mxu1 }
 0x810   : > { %v1447_v27 = vadd.f32 %v1446_v25, %v1321_v24  ;;  %v1452_v32 = vmax.f32 %v1445_v26, 0.0 }
 0x811   : > { %v1448_v29 = vpop.f32.mrf.mxu1 }
 0x812   : > { %v1449_v30 = vadd.f32 %v1448_v29, %v1325_v21  ;;  %v1453_v31 = vmax.f32 %v1447_v27, 0.0 }
 0x814   : > { %v1454_v33 = vmax.f32 %v1449_v30, 0.0  ;;  %v1455_v35 = vpack.c.bf16 %v1453_v31, %v1451_v0 }
 0x816   : > { %v1456_v34 = vpack.c.bf16 %v1454_v33, %v1452_v32 }
 0x818   : > { %1622 = vmatprep.mubr.bf16.mxu0 %v1456_v34 }
 0x819   : > { %1623 = vmatmul.mubr.bf16.vlgmr.msra.gmra.mxu0 %v1455_v35 }
 0x8d9   : > { %v1976_v36 = vpop.f32.mrf.mxu0 }
 0x8db   : > { %v1977_v38 = vpop.f32.mrf.mxu0 }
 0x8dc   : > { %v1978_v40 = vadd.f32 %v1977_v38, %v1976_v36 }
 0x8dd   : > { %v1979_v41 = vpop.f32.mrf.mxu0 }
 0x8de   : > { %v1625_v42 = vadd.f32 %v1978_v40, %v1900_v37 }
 0x8df   : > { %v1980_v43 = vpop.f32.mrf.mxu0 }
 0x8e0   : > { %v1981_v44 = vadd.f32 %v1980_v43, %v1979_v41  ;;  %v1631_v45 = vadd.f32 %v1625_v42, %v1297_v7 }
 0x8e2   : > { %v1628_v46 = vadd.f32 %v1981_v44, %v1900_v37  ;;  %1635 = vadd.xlane.f32.xlu1 %v1631_v45 }
 0x8e4   : > { %v1632_v47 = vadd.f32 %v1628_v46, %v1298_v8 }
 0x8e6   : > { %1637 = vadd.xlane.f32.xlu0 %v1632_v47 }
 0x96b   : > { %v1636_v48 = vpop.xlane.xlu1 %1635 }
 0x96c   : > { %v1639_v49 = vmul.f32 0.0078125, %v1636_v48 }
 0x96e   : > { %v1641_v50 = vsub.f32 %v1631_v45, %v1639_v49 }
 0x96f   : > { %v1638_v51 = vpop.xlane.xlu0 %1637 }
 0x970   : > { %v1640_v52 = vmul.f32 0.0078125, %v1638_v51  ;;  %v1643_v53 = vmul.f32 %v1641_v50, %v1641_v50 }
 0x972   : > { %v1642_v54 = vsub.f32 %v1632_v47, %v1640_v52  ;;  %1645 = vadd.xlane.f32.xlu1 %v1643_v53 }
 0x974   : > { %v1644_v55 = vmul.f32 %v1642_v54, %v1642_v54 }
 0x976   : > { %1647 = vadd.xlane.f32.xlu0 %v1644_v55 }
 0x9fb   : > { %v1646_v56 = vpop.xlane.xlu1 %1645 }
 0x9fc   : > { %v1649_v1 = vmul.f32 0.007874016, %v1646_v56 }
 0x9fe   : > { %2316 = vrsqrt.f32 %v1649_v1  ;;  %vm1653_vm9 = vcmp.eq.f32.partialorder %v1649_v1, inf  ;;  %v1656_v61 = vand.u32 2147483648, %v1649_v1  ;;  %vm1655_vm10 = vcmp.eq.f32.partialorder %v1649_v1, 0.0 }
 0x9ff   : > { %v1648_v57 = vpop.xlane.xlu0 %1647 }
 0xa00   : > { %v1650_v58 = vmul.f32 0.007874016, %v1648_v57 }
 0xa02   : > { %2318 = vrsqrt.f32 %v1650_v58  ;;  %vm1660_vm11 = vcmp.eq.f32.partialorder %v1650_v58, inf  ;;  %v1663_v4 = vand.u32 2147483648, %v1650_v58  ;;  %vm1662_vm12 = vcmp.eq.f32.partialorder %v1650_v58, 0.0 }
 0xa0b   : > { %v2317_v59 = vpop.eup %2316 }
 0xa0c   : > { %v1652_v60 = vmul.f32 %v2317_v59, %v1649_v1 }
 0xa0e   : > { %v1654_v62 = vsel %vm1653_vm9, %v1649_v1, %v1652_v60 }
 0xa0f   : > { %v2319_v63 = vpop.eup %2318  ;;  %v1657_v2 = vsel %vm1655_vm10, %v1656_v61, %v1654_v62 }
 0xa10   : > { %v1665_v3 = vadd.f32 1e-06, %v1657_v2  ;;  %v1659_v39 = vmul.f32 %v2319_v63, %v1650_v58 }
 0xa12   : > { %2320 = vrcp.f32 %v1665_v3  ;;  %v1661_v5 = vsel %vm1660_vm11, %v1650_v58, %v1659_v39 }
 0xa13   : > { %v1664_v6 = vsel %vm1662_vm12, %v1663_v4, %v1661_v5 }
 0xa14   : > { %v1666_v7 = vadd.f32 1e-06, %v1664_v6 }
 0xa16   : > { %2322 = vrcp.f32 %v1666_v7 }
 0xa1f   : > { %v2321_v8 = vpop.eup %2320 }
 0xa20   : > { %v1671_v10 = vmul.f32 %v2321_v8, %v1641_v50 }
 0xa22   : > { %v1677_v12 = vmul.f32 %v1917_v9, %v1671_v10 }
 0xa23   : > { %v2323_v13 = vpop.eup %2322 }
 0xa24   : > { %v1672_v14 = vmul.f32 %v2323_v13, %v1642_v54  ;;  %v1683_v15 = vadd.f32 %v1918_v11, %v1677_v12 }
 0xa26   : > { %v1678_v16 = vmul.f32 %v1917_v9, %v1672_v14  ;;  %1685 = vst [vmem:[%s367_s9] sm:$0xff] %v1683_v15 }
 0xa28   : > { %v1684_v17 = vadd.f32 %v1918_v11, %v1678_v16 }
 0xa2a   : > { %1686 = vst [vmem:[%s367_s9 + $0x8] sm:$0xff] %v1684_v17 }
 0xa2b   : > { %2495 = shalt.err (!%p2492_p3)
}
 0xa2c   : > { %s2496_s16 = scalar_lea.hbm %s2935_s21, 256  ;;  %s2500_s12 = scalar_lea.hbm %s2987_s7, 512 }
 0xa2d   : > { %p2497_p1 = scmp.ne.s32.totalorder %s2935_s21, %s2496_s16  ;;  %p2501_p11 = scmp.lt.s32.totalorder %s2935_s21, %s2987_s7 }
 0xa2e   : > { %p2502_p12 = scmp.lt.s32.totalorder %s2500_s12, %s2496_s16 }
 0xa2f   : > { %p2498_p6 = pnand %p2497_p1, %p3014_p4 }
 0xa30   : > { %p2503_p13 = por %p2502_p12, %p2501_p11 }
 0xa31   : > { %p2499_p9 = pneg %p2498_p6 }
 0xa33   : > { %p2504_p0 = pnand %p2503_p13, %p2499_p9 }
 0xa35   : > { %2507 = shalt.err (!%p2504_p0)
}
 0xa36   : > { %s2579_s20 = smov 128   ;;  %s2580_s17 = smov 8  }
 0xa37   : > { %2092 = dma.vmem_to_hbm [thread:$0]  (%p3014_p4), %s2937_s29, 256, %s2935_s21, %s1688_s19, %s2579_s20, %s2579_s20, %s2580_s17  }
 0xa38 PF: > { %s1716_s11 = sand.u32 1, %s2546_s24   ;;  %p3015_p2 = scmp.ne.s32.totalorder %s3002_s13, 0 }
 0xa39   : > { %p3016_p5 = scmp.ge.s32.totalorder %s2558_s27, 2  ;;  %s1717_s30 = scalar_lea.sflag [#allocation4], %s1716_s11 }
 0xa3b   : > { %p2115_p7 = pnand %p3016_p5, %p3015_p2 }
 0xa3d   : > { %p2116_p10 = pneg %p2115_p7 }
 0xa3f   : > { %2541 = dma.done.wait (%p2116_p10), %s1717_s30, 256  }
 0xa40   : > { %2543 = vsyncadd (%p2116_p10), %s1717_s30, 4294967040  ;;  %p23_p8 = scmp.ge.s32.totalorder %s2719_s14, 4   ;;  %s3017_s24 = smov %s2550_s25 }
 0xa41   : > { %s3018_s25 = smov %s2554_s26  ;;  %s3019_s26 = smov %s2731_s15 }
 0xa42   : > { %s3020_s27 = smov %s2719_s14  ;;  %25 = sbr.rel (!%p23_p8) target bundleno = 10 (0xa), region = 113 }
 0xa47   :  { %1722 = vsyncpa [#allocation3], 1 }
 0xa48   :  { %1724 = vsyncpa [#allocation3 + $0x1], 1 }
 0xa49   :  { %1725 = vsyncpa [#allocation6], 1 }
 0xa4a   :  { %1726 = vsyncpa [#allocation9], 1 }
 0xa4b   :  { %1727 = vsyncpa [#allocation12], 1 }
 0xa4c   :  { %1728 = vsyncpa [#allocation4], 1 }
 0xa4d   :  { %1730 = vsyncpa [#allocation4 + $0x1], 1 }

</bundles_post_ra>
